<compile_context>
chip_gen: v5e
topology: v5e:2x2
jax: 0.10.0
libtpu: 0.0.40
codegen_flags: <defaults>
</compile_context>

<pallas_src>
import functools

import jax
import jax.numpy as jnp
from jax.experimental import pallas as pl
from jax.experimental.pallas import tpu as pltpu

# ----------------------------- problem sizes --------------------------------
B, C, H, W = 2, 4, 16, 16        # NCHW input
P = H * W                        # 256 spatial positions per image
M = B * P                        # 512 = batch*spatial on the lane axis
HID = 32                         # encoder / unet hidden width
S_DIM = 16                       # "s" latent dim
Z_DIM = 16                       # "z" latent dim
NUM_CLASSES = 10
N_STEPS = 5                      # n_attack_steps

# --------------------- packed-slab layout (static offsets) -------------------
# xe (f32, (XE_ROWS, M)): rows [0:C) = x, rows [C:C+B) = per-batch one-hot.
X_ROW, EXP_ROW, XE_ROWS = 0, C, 8
# wmat (bf16, (WMAT_ROWS, HID)): pre-composed matmul weights.
FILM_ROW = 0                      # W_film            (HID, HID)
U2W_ROW = FILM_ROW + HID          # u2_w * dt         (C, HID)
CLSW_ROW = U2W_ROW + C            # W_cls             (NUM_CLASSES, HID)
WMAT_ROWS = 48
# wsmall (f32, (HID, WSMALL_COLS)): small conv weights + all bias columns.
ENC_W_COL = 0                     # encoder conv weight (HID, C)
U1_W_COL = ENC_W_COL + C          # unet conv1 weight   (HID, C)
ENC_B_COL = U1_W_COL + C          # encoder conv bias   (HID, 1)
STEP_COL = ENC_B_COL + 1          # per-step bias cols  (HID, N_STEPS)
U2B_COL = STEP_COL + N_STEPS      # u2_b * dt           rows [0:C)
CLSB_COL = U2B_COL + 1            # classifier bias     rows [0:NUM_CLASSES)
WSMALL_COLS = CLSB_COL + 1        # = 16


# ------------------------------ fused Pallas kernel --------------------------
def _fused_forward_kernel(xe_ref, pool_ref, wmat_ref, wsmall_ref, out_ref, *,
                          n_steps):
    """Whole CausalFlowAttackable forward in one kernel.

    Layout: activations are (channels, M) with M = B*H*W = 512 on lanes.
    1x1 convs are W(Cout,Cin) @ X(Cin,M); GAP and the per-batch FiLM broadcast
    are matmuls against small constant matrices (pool: (M,B), expand: (B,M)).
    bf16 MXU operands, f32 accumulation, f32 VPU math.
    """
    f32, bf16 = jnp.float32, jnp.bfloat16
    mm = lambda a, b: jnp.dot(a, b, preferred_element_type=f32)

    # ---- carve the packed slabs (static slices) ----
    x = xe_ref[X_ROW:X_ROW + C, :]                           # (C, M)   f32
    expand = xe_ref[EXP_ROW:EXP_ROW + B, :]                  # (B, M)   f32 one-hot
    pool = pool_ref[...]                                     # (M, B)   f32 (= onehot/P)

    w_film = wmat_ref[FILM_ROW:FILM_ROW + HID, :]            # (HID, HID) bf16
    u2_w = wmat_ref[U2W_ROW:U2W_ROW + C, :]                  # (C, HID)   bf16, dt folded
    w_cls = wmat_ref[CLSW_ROW:CLSW_ROW + NUM_CLASSES, :]     # (NCLS, HID) bf16

    enc_w = wsmall_ref[:, ENC_W_COL:ENC_W_COL + C].astype(bf16)   # (HID, C)
    u1_w = wsmall_ref[:, U1_W_COL:U1_W_COL + C].astype(bf16)      # (HID, C)
    enc_b = wsmall_ref[:, ENC_B_COL:ENC_B_COL + 1]                # (HID, 1) f32
    u2_b = wsmall_ref[0:C, U2B_COL:U2B_COL + 1]                   # (C, 1)   f32, dt folded
    cls_b = wsmall_ref[0:NUM_CLASSES, CLSB_COL:CLSB_COL + 1]      # (NCLS,1) f32

    def encode_pooled(img_bf16):
        # relu(1x1 conv) -> global average pool (mean as matmul on the MXU).
        h = jnp.maximum(mm(enc_w, img_bf16) + enc_b, 0.0)         # (HID, M) f32
        return mm(h, pool)                                        # (HID, B) f32

    # ---- encoder(x) -> FiLM (encoder->FiLM linear chain pre-composed) ----
    g0 = encode_pooled(x.astype(bf16))                            # (HID, B)
    film_g = mm(w_film, g0.astype(bf16))                          # (HID, B)
    film_m = mm(film_g, expand)                                   # (HID, M) batch-broadcast

    # ---- Euler flow integration (statically unrolled; dt folded into u2) ----
    x_t = x
    for i in range(n_steps):
        # per-step bias column: u1_b + b_film + (i*dt)*cond_t_w  -> (HID, 1)
        col = wsmall_ref[:, STEP_COL + i:STEP_COL + i + 1]
        h1 = jnp.maximum(mm(u1_w, x_t.astype(bf16)) + film_m + col, 0.0)   # (HID, M)
        x_t = x_t + mm(u2_w, h1.astype(bf16)) + u2_b                        # (C, M)

    x_pur = jnp.clip(x_t, 0.0, 1.0)

    # ---- re-encode purified image + classify (chain pre-composed) ----
    g1 = encode_pooled(x_pur.astype(bf16))                        # (HID, B)
    out_ref[...] = mm(w_cls, g1.astype(bf16)) + cls_b             # (NCLS, B)


# ------------------------------ parameters -----------------------------------
def init_params(key):
    ks = jax.random.split(key, 11)
    w = lambda k, shp, s: jax.random.normal(k, shp, jnp.float32) * s
    zeros = lambda shp: jnp.zeros(shp, jnp.float32)
    return {
        # encoder (weights stored (Dout, Din); biases (Dout, 1))
        "enc_conv_w": w(ks[0], (HID, C), 0.3),        "enc_conv_b": zeros((HID, 1)),
        "enc_fc_s_w": w(ks[1], (S_DIM, HID), 0.2),    "enc_fc_s_b": zeros((S_DIM, 1)),
        "enc_fc_z_w": w(ks[2], (Z_DIM, HID), 0.2),    "enc_fc_z_b": zeros((Z_DIM, 1)),
        # logvar heads exist on the encoder but forward() discards them,
        # so they never reach the kernel (no dead work).
        "enc_fc_ls_w": w(ks[3], (S_DIM, HID), 0.2),   "enc_fc_ls_b": zeros((S_DIM, 1)),
        "enc_fc_lz_w": w(ks[4], (Z_DIM, HID), 0.2),   "enc_fc_lz_b": zeros((Z_DIM, 1)),
        # purifier unet: FiLM conditioner split column-wise as [s | z | t]
        "uni_cond_s_w": w(ks[5], (HID, S_DIM), 0.2),
        "uni_cond_z_w": w(ks[6], (HID, Z_DIM), 0.2),
        "uni_cond_t_w": w(ks[7], (HID, 1), 0.2),
        "uni_cond_b": zeros((HID, 1)),
        "uni_conv1_w": w(ks[8], (HID, C), 0.3),       "uni_conv1_b": zeros((HID, 1)),
        "uni_conv2_w": w(ks[9], (C, HID), 0.1),       "uni_conv2_b": zeros((C, 1)),
        # latent classifier
        "cls_w": w(ks[10], (NUM_CLASSES, S_DIM), 0.3), "cls_b": zeros((NUM_CLASSES, 1)),
    }


# ------------------- host-side pre-composition + slab packing ----------------
def _precompose_and_pack(params, x_nchw):
    f32, bf16 = jnp.float32, jnp.bfloat16
    dt = 1.0 / N_STEPS

    # data slab: NCHW -> channels-on-sublanes, batch*spatial on lanes (C, M),
    # plus the per-batch one-hot "expand" rows used for the FiLM broadcast.
    x_cm = jnp.transpose(x_nchw, (1, 0, 2, 3)).reshape(C, M).astype(f32)
    col_batch = jnp.arange(M, dtype=jnp.int32) // P
    onehot = (col_batch[None, :] == jnp.arange(B, dtype=jnp.int32)[:, None]).astype(f32)
    xe = jnp.zeros((XE_ROWS, M), f32)
    xe = xe.at[X_ROW:X_ROW + C].set(x_cm).at[EXP_ROW:EXP_ROW + B].set(onehot)
    pool = onehot.T / float(P)                                     # (M, B) GAP-as-matmul

    # exact trace-time composition of the linear chains (f32 algebra):
    #   film  = cond_s_w@(s_w@g + s_b) + cond_z_w@(z_w@g + z_b) + cond_b + t*cond_t_w
    #   logit = cls_w@(s_w@g + s_b) + cls_b
    w_film = (params["uni_cond_s_w"] @ params["enc_fc_s_w"]
              + params["uni_cond_z_w"] @ params["enc_fc_z_w"])     # (HID, HID)
    b_film = (params["uni_cond_s_w"] @ params["enc_fc_s_b"]
              + params["uni_cond_z_w"] @ params["enc_fc_z_b"]
              + params["uni_cond_b"])                              # (HID, 1)
    w_cls = params["cls_w"] @ params["enc_fc_s_w"]                 # (NCLS, HID)
    b_cls = params["cls_w"] @ params["enc_fc_s_b"] + params["cls_b"]   # (NCLS, 1)

    wmat = jnp.zeros((WMAT_ROWS, HID), f32)
    wmat = wmat.at[FILM_ROW:FILM_ROW + HID].set(w_film)
    wmat = wmat.at[U2W_ROW:U2W_ROW + C].set(params["uni_conv2_w"] * dt)    # dt folded
    wmat = wmat.at[CLSW_ROW:CLSW_ROW + NUM_CLASSES].set(w_cls)
    wmat = wmat.astype(bf16)                                       # bf16 MXU operands

    # per-step bias columns: u1_b + b_film + (i*dt)*cond_t_w  ->  (HID, N_STEPS)
    t_vals = (jnp.arange(N_STEPS, dtype=f32) * dt)[None, :]
    step_bias = params["uni_conv1_b"] + b_film + params["uni_cond_t_w"] * t_vals

    wsmall = jnp.zeros((HID, WSMALL_COLS), f32)
    wsmall = wsmall.at[:, ENC_W_COL:ENC_W_COL + C].set(params["enc_conv_w"])
    wsmall = wsmall.at[:, U1_W_COL:U1_W_COL + C].set(params["uni_conv1_w"])
    wsmall = wsmall.at[:, ENC_B_COL:ENC_B_COL + 1].set(params["enc_conv_b"])
    wsmall = wsmall.at[:, STEP_COL:STEP_COL + N_STEPS].set(step_bias)
    wsmall = wsmall.at[0:C, U2B_COL:U2B_COL + 1].set(params["uni_conv2_b"] * dt)
    wsmall = wsmall.at[0:NUM_CLASSES, CLSB_COL:CLSB_COL + 1].set(b_cls)

    return xe, pool, wmat, wsmall


# advisory cost estimate for XLA's scheduler
_FLOPS = (2 * HID * C * M * (2 + 2 * N_STEPS)     # enc conv x2, u1 xN, u2 xN
          + 2 * 2 * HID * M * B                    # two GAP-as-matmul pools
          + 2 * HID * HID * B                      # W_film @ g0
          + 2 * HID * B * M                        # FiLM batch-broadcast matmul
          + 2 * NUM_CLASSES * HID * B)             # classifier
_BYTES = (XE_ROWS * M * 4 + M * B * 4 + WMAT_ROWS * HID * 2
          + HID * WSMALL_COLS * 4 + NUM_CLASSES * B * 4)


# --------------------------- CausalFlowAttackable ----------------------------
def causal_flow_attackable_forward(params, x_nchw):
    xe, pool, wmat, wsmall = _precompose_and_pack(params, x_nchw)

    logits_cb = pl.pallas_call(
        functools.partial(_fused_forward_kernel, n_steps=N_STEPS),
        out_shape=jax.ShapeDtypeStruct((NUM_CLASSES, B), jnp.float32),
        in_specs=[pl.BlockSpec(memory_space=pltpu.MemorySpace.VMEM)] * 4,
        out_specs=pl.BlockSpec(memory_space=pltpu.MemorySpace.VMEM),
        cost_estimate=pl.CostEstimate(flops=_FLOPS, transcendentals=0,
                                      bytes_accessed=_BYTES),
    )(xe, pool, wmat, wsmall)

    return logits_cb.T                 # (B, NUM_CLASSES)


# --------------------------- pure-JAX reference ------------------------------
def _reference_forward(params, x_nchw):
    """Unfused, un-composed f32 reference of the same forward (sanity check)."""
    f32 = jnp.float32
    x = jnp.transpose(x_nchw, (0, 2, 3, 1)).reshape(B, P, C).astype(f32)

    def enc(img):
        h = jnp.maximum(jnp.einsum("bpc,hc->bph", img, params["enc_conv_w"])
                        + params["enc_conv_b"][:, 0], 0.0)
        g = jnp.mean(h, axis=1)
        s = g @ params["enc_fc_s_w"].T + params["enc_fc_s_b"][:, 0]
        z = g @ params["enc_fc_z_w"].T + params["enc_fc_z_b"][:, 0]
        return s, z

    s_cond, z_cond = enc(x)
    cond_w = jnp.concatenate(
        [params["uni_cond_s_w"], params["uni_cond_z_w"], params["uni_cond_t_w"]], axis=1)

    dt = 1.0 / N_STEPS
    x_t = x
    for i in range(N_STEPS):
        t = jnp.full((B, 1), i * dt, f32)
        cond = jnp.concatenate([s_cond, z_cond, t], axis=1)
        film = cond @ cond_w.T + params["uni_cond_b"][:, 0]
        h = jnp.maximum(jnp.einsum("bpc,hc->bph", x_t, params["uni_conv1_w"])
                        + params["uni_conv1_b"][:, 0] + film[:, None, :], 0.0)
        v = jnp.einsum("bph,ch->bpc", h, params["uni_conv2_w"]) + params["uni_conv2_b"][:, 0]
        x_t = x_t + v * dt

    x_pur = jnp.clip(x_t, 0.0, 1.0)
    s_fin, _ = enc(x_pur)
    return s_fin @ params["cls_w"].T + params["cls_b"][:, 0]


# ----------------------------------- main ------------------------------------
if __name__ == "__main__":
    key = jax.random.PRNGKey(0)
    k_param, k_x = jax.random.split(key)

    params = init_params(k_param)
    x = jax.random.uniform(k_x, (B, C, H, W), jnp.float32)   # NCHW, like PyTorch

    fwd = jax.jit(causal_flow_attackable_forward)
    logits = jax.block_until_ready(fwd(params, x))

    assert logits.shape == (B, NUM_CLASSES), logits.shape
    assert bool(jnp.all(jnp.isfinite(logits)))

    # semantic check against the unfused, un-composed f32 reference; the kernel
    # uses bf16 MXU operands (f32 accumulate / f32 VPU math) so use 2e-2.
    ref = jax.block_until_ready(jax.jit(_reference_forward)(params, x))
    assert bool(jnp.allclose(logits, ref, atol=2e-2, rtol=2e-2)), (logits, ref)

    print("KERNEL_OK")
</pallas_src>

<mosaic_0001>
module attributes {stable_mosaic.version = 11 : i64} {
  func.func @_fused_forward_kernel(%arg0: memref<8x512xf32, #tpu.memory_space<vmem>>, %arg1: memref<512x2xf32, #tpu.memory_space<vmem>>, %arg2: memref<48x32xbf16, #tpu.memory_space<vmem>>, %arg3: memref<32x16xf32, #tpu.memory_space<vmem>>, %arg4: memref<10x2xf32, #tpu.memory_space<vmem>>) attributes {dimension_semantics = [], scalar_prefetch = 0 : i64, scratch_operands = 0 : i64, tpu.core_type = #tpu.core_type<tc>} {
    %c0 = arith.constant 0 : index
    %c0_0 = arith.constant 0 : index
    %0 = vector.load %arg0[%c0, %c0_0] : memref<8x512xf32, #tpu.memory_space<vmem>>, vector<4x512xf32>
    %c4 = arith.constant 4 : index
    %c0_1 = arith.constant 0 : index
    %1 = vector.load %arg0[%c4, %c0_1] : memref<8x512xf32, #tpu.memory_space<vmem>>, vector<2x512xf32>
    %c0_2 = arith.constant 0 : index
    %c0_3 = arith.constant 0 : index
    %2 = vector.load %arg1[%c0_2, %c0_3] : memref<512x2xf32, #tpu.memory_space<vmem>>, vector<512x2xf32>
    %c0_4 = arith.constant 0 : index
    %c0_5 = arith.constant 0 : index
    %3 = vector.load %arg2[%c0_4, %c0_5] : memref<48x32xbf16, #tpu.memory_space<vmem>>, vector<32x32xbf16>
    %c32 = arith.constant 32 : index
    %c0_6 = arith.constant 0 : index
    %4 = vector.load %arg2[%c32, %c0_6] : memref<48x32xbf16, #tpu.memory_space<vmem>>, vector<4x32xbf16>
    %c36 = arith.constant 36 : index
    %c0_7 = arith.constant 0 : index
    %5 = vector.load %arg2[%c36, %c0_7] : memref<48x32xbf16, #tpu.memory_space<vmem>>, vector<10x32xbf16>
    %c0_8 = arith.constant 0 : index
    %c0_9 = arith.constant 0 : index
    %6 = vector.load %arg3[%c0_8, %c0_9] : memref<32x16xf32, #tpu.memory_space<vmem>>, vector<32x4xf32>
    %7 = arith.truncf %6 : vector<32x4xf32> to vector<32x4xbf16>
    %c0_10 = arith.constant 0 : index
    %c4_11 = arith.constant 4 : index
    %8 = vector.load %arg3[%c0_10, %c4_11] : memref<32x16xf32, #tpu.memory_space<vmem>>, vector<32x4xf32>
    %9 = arith.truncf %8 : vector<32x4xf32> to vector<32x4xbf16>
    %c0_12 = arith.constant 0 : index
    %c8 = arith.constant 8 : index
    %10 = vector.load %arg3[%c0_12, %c8] : memref<32x16xf32, #tpu.memory_space<vmem>>, vector<32x1xf32>
    %c0_13 = arith.constant 0 : index
    %c14 = arith.constant 14 : index
    %11 = vector.load %arg3[%c0_13, %c14] : memref<32x16xf32, #tpu.memory_space<vmem>>, vector<4x1xf32>
    %c0_14 = arith.constant 0 : index
    %c15 = arith.constant 15 : index
    %12 = vector.load %arg3[%c0_14, %c15] : memref<32x16xf32, #tpu.memory_space<vmem>>, vector<10x1xf32>
    %13 = arith.truncf %0 : vector<4x512xf32> to vector<4x512xbf16>
    %cst = arith.constant dense<0.000000e+00> : vector<32x512xf32>
    %14 = tpu.matmul %7, %13, %cst {dimension_numbers = #tpu.dot_dimension_numbers<[1], [0], [0], [1], [0, 0, 1, 1], [], []>} : vector<32x4xbf16>, vector<4x512xbf16>, vector<32x512xf32> -> vector<32x512xf32>
    %15 = vector.broadcast %10 : vector<32x1xf32> to vector<32x512xf32>
    %16 = arith.addf %14, %15 : vector<32x512xf32>
    %cst_15 = arith.constant 0.000000e+00 : f32
    %17 = vector.broadcast %cst_15 : f32 to vector<32x512xf32>
    %18 = arith.maximumf %16, %17 : vector<32x512xf32>
    %cst_16 = arith.constant dense<0.000000e+00> : vector<32x2xf32>
    %19 = tpu.matmul %18, %2, %cst_16 {dimension_numbers = #tpu.dot_dimension_numbers<[1], [0], [0], [1], [0, 0, 1, 1], [], []>} : vector<32x512xf32>, vector<512x2xf32>, vector<32x2xf32> -> vector<32x2xf32>
    %20 = arith.truncf %19 : vector<32x2xf32> to vector<32x2xbf16>
    %cst_17 = arith.constant dense<0.000000e+00> : vector<32x2xf32>
    %21 = tpu.matmul %3, %20, %cst_17 {dimension_numbers = #tpu.dot_dimension_numbers<[1], [0], [0], [1], [0, 0, 1, 1], [], []>} : vector<32x32xbf16>, vector<32x2xbf16>, vector<32x2xf32> -> vector<32x2xf32>
    %cst_18 = arith.constant dense<0.000000e+00> : vector<32x512xf32>
    %22 = tpu.matmul %21, %1, %cst_18 {dimension_numbers = #tpu.dot_dimension_numbers<[1], [0], [0], [1], [0, 0, 1, 1], [], []>} : vector<32x2xf32>, vector<2x512xf32>, vector<32x512xf32> -> vector<32x512xf32>
    %c0_19 = arith.constant 0 : index
    %c9 = arith.constant 9 : index
    %23 = vector.load %arg3[%c0_19, %c9] : memref<32x16xf32, #tpu.memory_space<vmem>>, vector<32x1xf32>
    %24 = arith.truncf %0 : vector<4x512xf32> to vector<4x512xbf16>
    %cst_20 = arith.constant dense<0.000000e+00> : vector<32x512xf32>
    %25 = tpu.matmul %9, %24, %cst_20 {dimension_numbers = #tpu.dot_dimension_numbers<[1], [0], [0], [1], [0, 0, 1, 1], [], []>} : vector<32x4xbf16>, vector<4x512xbf16>, vector<32x512xf32> -> vector<32x512xf32>
    %26 = arith.addf %25, %22 : vector<32x512xf32>
    %27 = vector.broadcast %23 : vector<32x1xf32> to vector<32x512xf32>
    %28 = arith.addf %26, %27 : vector<32x512xf32>
    %cst_21 = arith.constant 0.000000e+00 : f32
    %29 = vector.broadcast %cst_21 : f32 to vector<32x512xf32>
    %30 = arith.maximumf %28, %29 : vector<32x512xf32>
    %31 = arith.truncf %30 : vector<32x512xf32> to vector<32x512xbf16>
    %cst_22 = arith.constant dense<0.000000e+00> : vector<4x512xf32>
    %32 = tpu.matmul %4, %31, %cst_22 {dimension_numbers = #tpu.dot_dimension_numbers<[1], [0], [0], [1], [0, 0, 1, 1], [], []>} : vector<4x32xbf16>, vector<32x512xbf16>, vector<4x512xf32> -> vector<4x512xf32>
    %33 = arith.addf %0, %32 : vector<4x512xf32>
    %34 = vector.broadcast %11 : vector<4x1xf32> to vector<4x512xf32>
    %35 = arith.addf %33, %34 : vector<4x512xf32>
    %c0_23 = arith.constant 0 : index
    %c10 = arith.constant 10 : index
    %36 = vector.load %arg3[%c0_23, %c10] : memref<32x16xf32, #tpu.memory_space<vmem>>, vector<32x1xf32>
    %37 = arith.truncf %35 : vector<4x512xf32> to vector<4x512xbf16>
    %cst_24 = arith.constant dense<0.000000e+00> : vector<32x512xf32>
    %38 = tpu.matmul %9, %37, %cst_24 {dimension_numbers = #tpu.dot_dimension_numbers<[1], [0], [0], [1], [0, 0, 1, 1], [], []>} : vector<32x4xbf16>, vector<4x512xbf16>, vector<32x512xf32> -> vector<32x512xf32>
    %39 = arith.addf %38, %22 : vector<32x512xf32>
    %40 = vector.broadcast %36 : vector<32x1xf32> to vector<32x512xf32>
    %41 = arith.addf %39, %40 : vector<32x512xf32>
    %cst_25 = arith.constant 0.000000e+00 : f32
    %42 = vector.broadcast %cst_25 : f32 to vector<32x512xf32>
    %43 = arith.maximumf %41, %42 : vector<32x512xf32>
    %44 = arith.truncf %43 : vector<32x512xf32> to vector<32x512xbf16>
    %cst_26 = arith.constant dense<0.000000e+00> : vector<4x512xf32>
    %45 = tpu.matmul %4, %44, %cst_26 {dimension_numbers = #tpu.dot_dimension_numbers<[1], [0], [0], [1], [0, 0, 1, 1], [], []>} : vector<4x32xbf16>, vector<32x512xbf16>, vector<4x512xf32> -> vector<4x512xf32>
    %46 = arith.addf %35, %45 : vector<4x512xf32>
    %47 = vector.broadcast %11 : vector<4x1xf32> to vector<4x512xf32>
    %48 = arith.addf %46, %47 : vector<4x512xf32>
    %c0_27 = arith.constant 0 : index
    %c11 = arith.constant 11 : index
    %49 = vector.load %arg3[%c0_27, %c11] : memref<32x16xf32, #tpu.memory_space<vmem>>, vector<32x1xf32>
    %50 = arith.truncf %48 : vector<4x512xf32> to vector<4x512xbf16>
    %cst_28 = arith.constant dense<0.000000e+00> : vector<32x512xf32>
    %51 = tpu.matmul %9, %50, %cst_28 {dimension_numbers = #tpu.dot_dimension_numbers<[1], [0], [0], [1], [0, 0, 1, 1], [], []>} : vector<32x4xbf16>, vector<4x512xbf16>, vector<32x512xf32> -> vector<32x512xf32>
    %52 = arith.addf %51, %22 : vector<32x512xf32>
    %53 = vector.broadcast %49 : vector<32x1xf32> to vector<32x512xf32>
    %54 = arith.addf %52, %53 : vector<32x512xf32>
    %cst_29 = arith.constant 0.000000e+00 : f32
    %55 = vector.broadcast %cst_29 : f32 to vector<32x512xf32>
    %56 = arith.maximumf %54, %55 : vector<32x512xf32>
    %57 = arith.truncf %56 : vector<32x512xf32> to vector<32x512xbf16>
    %cst_30 = arith.constant dense<0.000000e+00> : vector<4x512xf32>
    %58 = tpu.matmul %4, %57, %cst_30 {dimension_numbers = #tpu.dot_dimension_numbers<[1], [0], [0], [1], [0, 0, 1, 1], [], []>} : vector<4x32xbf16>, vector<32x512xbf16>, vector<4x512xf32> -> vector<4x512xf32>
    %59 = arith.addf %48, %58 : vector<4x512xf32>
    %60 = vector.broadcast %11 : vector<4x1xf32> to vector<4x512xf32>
    %61 = arith.addf %59, %60 : vector<4x512xf32>
    %c0_31 = arith.constant 0 : index
    %c12 = arith.constant 12 : index
    %62 = vector.load %arg3[%c0_31, %c12] : memref<32x16xf32, #tpu.memory_space<vmem>>, vector<32x1xf32>
    %63 = arith.truncf %61 : vector<4x512xf32> to vector<4x512xbf16>
    %cst_32 = arith.constant dense<0.000000e+00> : vector<32x512xf32>
    %64 = tpu.matmul %9, %63, %cst_32 {dimension_numbers = #tpu.dot_dimension_numbers<[1], [0], [0], [1], [0, 0, 1, 1], [], []>} : vector<32x4xbf16>, vector<4x512xbf16>, vector<32x512xf32> -> vector<32x512xf32>
    %65 = arith.addf %64, %22 : vector<32x512xf32>
    %66 = vector.broadcast %62 : vector<32x1xf32> to vector<32x512xf32>
    %67 = arith.addf %65, %66 : vector<32x512xf32>
    %cst_33 = arith.constant 0.000000e+00 : f32
    %68 = vector.broadcast %cst_33 : f32 to vector<32x512xf32>
    %69 = arith.maximumf %67, %68 : vector<32x512xf32>
    %70 = arith.truncf %69 : vector<32x512xf32> to vector<32x512xbf16>
    %cst_34 = arith.constant dense<0.000000e+00> : vector<4x512xf32>
    %71 = tpu.matmul %4, %70, %cst_34 {dimension_numbers = #tpu.dot_dimension_numbers<[1], [0], [0], [1], [0, 0, 1, 1], [], []>} : vector<4x32xbf16>, vector<32x512xbf16>, vector<4x512xf32> -> vector<4x512xf32>
    %72 = arith.addf %61, %71 : vector<4x512xf32>
    %73 = vector.broadcast %11 : vector<4x1xf32> to vector<4x512xf32>
    %74 = arith.addf %72, %73 : vector<4x512xf32>
    %c0_35 = arith.constant 0 : index
    %c13 = arith.constant 13 : index
    %75 = vector.load %arg3[%c0_35, %c13] : memref<32x16xf32, #tpu.memory_space<vmem>>, vector<32x1xf32>
    %76 = arith.truncf %74 : vector<4x512xf32> to vector<4x512xbf16>
    %cst_36 = arith.constant dense<0.000000e+00> : vector<32x512xf32>
    %77 = tpu.matmul %9, %76, %cst_36 {dimension_numbers = #tpu.dot_dimension_numbers<[1], [0], [0], [1], [0, 0, 1, 1], [], []>} : vector<32x4xbf16>, vector<4x512xbf16>, vector<32x512xf32> -> vector<32x512xf32>
    %78 = arith.addf %77, %22 : vector<32x512xf32>
    %79 = vector.broadcast %75 : vector<32x1xf32> to vector<32x512xf32>
    %80 = arith.addf %78, %79 : vector<32x512xf32>
    %cst_37 = arith.constant 0.000000e+00 : f32
    %81 = vector.broadcast %cst_37 : f32 to vector<32x512xf32>
    %82 = arith.maximumf %80, %81 : vector<32x512xf32>
    %83 = arith.truncf %82 : vector<32x512xf32> to vector<32x512xbf16>
    %cst_38 = arith.constant dense<0.000000e+00> : vector<4x512xf32>
    %84 = tpu.matmul %4, %83, %cst_38 {dimension_numbers = #tpu.dot_dimension_numbers<[1], [0], [0], [1], [0, 0, 1, 1], [], []>} : vector<4x32xbf16>, vector<32x512xbf16>, vector<4x512xf32> -> vector<4x512xf32>
    %85 = arith.addf %74, %84 : vector<4x512xf32>
    %86 = vector.broadcast %11 : vector<4x1xf32> to vector<4x512xf32>
    %87 = arith.addf %85, %86 : vector<4x512xf32>
    %cst_39 = arith.constant 0.000000e+00 : f32
    %cst_40 = arith.constant 1.000000e+00 : f32
    %88 = vector.broadcast %cst_39 : f32 to vector<4x512xf32>
    %89 = arith.maximumf %88, %87 : vector<4x512xf32>
    %90 = vector.broadcast %cst_40 : f32 to vector<4x512xf32>
    %91 = arith.minimumf %90, %89 : vector<4x512xf32>
    %92 = arith.truncf %91 : vector<4x512xf32> to vector<4x512xbf16>
    %cst_41 = arith.constant dense<0.000000e+00> : vector<32x512xf32>
    %93 = tpu.matmul %7, %92, %cst_41 {dimension_numbers = #tpu.dot_dimension_numbers<[1], [0], [0], [1], [0, 0, 1, 1], [], []>} : vector<32x4xbf16>, vector<4x512xbf16>, vector<32x512xf32> -> vector<32x512xf32>
    %94 = vector.broadcast %10 : vector<32x1xf32> to vector<32x512xf32>
    %95 = arith.addf %93, %94 : vector<32x512xf32>
    %cst_42 = arith.constant 0.000000e+00 : f32
    %96 = vector.broadcast %cst_42 : f32 to vector<32x512xf32>
    %97 = arith.maximumf %95, %96 : vector<32x512xf32>
    %cst_43 = arith.constant dense<0.000000e+00> : vector<32x2xf32>
    %98 = tpu.matmul %97, %2, %cst_43 {dimension_numbers = #tpu.dot_dimension_numbers<[1], [0], [0], [1], [0, 0, 1, 1], [], []>} : vector<32x512xf32>, vector<512x2xf32>, vector<32x2xf32> -> vector<32x2xf32>
    %99 = arith.truncf %98 : vector<32x2xf32> to vector<32x2xbf16>
    %cst_44 = arith.constant dense<0.000000e+00> : vector<10x2xf32>
    %100 = tpu.matmul %5, %99, %cst_44 {dimension_numbers = #tpu.dot_dimension_numbers<[1], [0], [0], [1], [0, 0, 1, 1], [], []>} : vector<10x32xbf16>, vector<32x2xbf16>, vector<10x2xf32> -> vector<10x2xf32>
    %101 = vector.broadcast %12 : vector<10x1xf32> to vector<10x2xf32>
    %102 = arith.addf %100, %101 : vector<10x2xf32>
    %c0_45 = arith.constant 0 : index
    %c0_46 = arith.constant 0 : index
    %103 = vector.load %arg4[%c0_45, %c0_46] : memref<10x2xf32, #tpu.memory_space<vmem>>, vector<10x2xf32>
    tpu.vector_store %arg4[%c0_45, %c0_46], %102 {strides = array<i32>} : memref<10x2xf32, #tpu.memory_space<vmem>>, vector<10x2xf32>,
    return
  }
}

</mosaic_0001>

<bundles_post_ra>
// kernel: causal_flow_attackable_forward.1
= control target key start
LH: loop header
LB: loop body
LE: loop exit
PB: predicated region body
PF: predicated region fallthrough
CT: control target
= control target key end

     0   :  { %vm136_vm0 = vcmask 1041408   ;;  %v2071_v3 = vmov 8   ;;  %vm129_vm1 = vcmask 31744   ;;  %s2072_s29 = smov 124   ;;  %vm369_vm2 = vcmask 261120   ;;  %s3162_s0 = inlined_call_operand.vmem [shape: f32[8,512], index: 0, kind: input, shape index: {}]   ;;  %s3163_s3 = inlined_call_operand.vmem [shape: f32[32,16], index: 3, kind: input, shape index: {}]   ;;  %s3164_s1 = inlined_call_operand.vmem [shape: f32[512,2], index: 1, kind: input, shape index: {}]   ;;  %s3165_s2 = inlined_call_operand.vmem [shape: bf16[48,32], index: 2, kind: input, shape index: {}]   ;;  %s3166_s4 = inlined_call_operand.vmem [shape: f32[10,2], index: 4, kind: output, shape index: {}]  }
   0x1   :  { %v2108_v0 = vld [vmem:[%s3162_s0] sm:$0xf]  ;;  %v2113_v1 = vld [vmem:[%s3162_s0 + $0x8] sm:$0xf]  ;;  %v2118_v2 = vld [vmem:[%s3162_s0 + $0x10] sm:$0xf]  ;;  %1980 = vset.pattern.permute.xlu0 %v2071_v3  ;;  %1981 = vset.pattern.permute.xlu1 %v2071_v3 }
   0x2   :  { %v105_v4 = vpack.c.bf16 %v2108_v0, %v2108_v0  ;;  %v106_v5 = vpack.c.bf16 %v2113_v1, %v2113_v1  ;;  %v107_v6 = vpack.c.bf16 %v2118_v2, %v2118_v2  ;;  %v2129_v7 = vld [vmem:[%s3162_s0 + $0x18] sm:$0xf]  ;;  %v2134_v8 = vld [vmem:[%s3163_s3] sm:$0xff]  ;;  %v2139_v9 = vld [vmem:[%s3163_s3 + $0x8] sm:$0xff]  ;;  %vm403_vm3 = vcmask 15360  }
   0x3   :  { %v108_v10 = vpack.c.bf16 %v2129_v7, %v2129_v7  ;;  %111 = vperm.xlu0 %1980, %v2134_v8   ;;  %v2147_v11 = vld [vmem:[%s3163_s3 + $0x10] sm:$0xff]  ;;  %v2160_v15 = vpack.c.bf16 %v2139_v9, %v2134_v8  ;;  %v41_v16 = vld [vmem:[%s3164_s1 + $0x78] sm:$0xff]  ;;  %v39_v22 = vld [vmem:[%s3164_s1 + $0x68] sm:$0xff]  ;;  %vm1851_vm4 = vcmask 9216  }
   0x4   :  { %v2150_v12 = vsel %vm136_vm0, %v105_v4, 0  ;;  %v2153_v13 = vsel %vm136_vm0, %v106_v5, 0  ;;  %v2156_v14 = vsel %vm136_vm0, %v107_v6, 0  ;;  %121 = vperm.xlu1 %1981, %v2147_v11   ;;  %v57_v17 = vld [vmem:[%s3164_s1 + $0xf8] sm:$0xff]  ;;  %v40_v19 = vld [vmem:[%s3164_s1 + $0x70] sm:$0xff]  ;;  %v55_v23 = vld [vmem:[%s3164_s1 + $0xe8] sm:$0xff] }
   0x5   :  { %3181 = vst [vmem:[#allocation2_spill] sm:$0xff] %v2160_v15  ;;  %156 = vmatpush.bf16.msra.mxu0 %v2150_v12  ;;  %175 = vmatpush.bf16.msra.mxu1 %v2153_v13  ;;  %v2172_v18 = vsel %vm136_vm0, %v108_v10, 0  ;;  %v56_v20 = vld [vmem:[%s3164_s1 + $0xf0] sm:$0xff]  ;;  %v73_v21 = vld [vmem:[%s3164_s1 + $0x178] sm:$0xff]  ;;  %v38_v26 = vld [vmem:[%s3164_s1 + $0x60] sm:$0xff] }
   0x6   :  { %194 = vmatpush.bf16.msra.mxu2 %v2156_v14  ;;  %213 = vmatpush.bf16.msra.mxu3 %v2172_v18  ;;  %v89_v24 = vld [vmem:[%s3164_s1 + $0x1f8] sm:$0xff]  ;;  %v72_v27 = vld [vmem:[%s3164_s1 + $0x170] sm:$0xff]  ;;  %v54_v28 = vld [vmem:[%s3164_s1 + $0xe0] sm:$0xff] }
   0x7   :  { %v2205_v25 = vld [vmem:[%s3163_s3 + $0x18] sm:$0xff]  ;;  %v88_v29 = vld [vmem:[%s3164_s1 + $0x1f0] sm:$0xff]  ;;  %v71_v31 = vld [vmem:[%s3164_s1 + $0x168] sm:$0xff]  ;;  %542 = vrot.lane.b32.xlu2 %v2160_v15, %s2072_s29 }
   0x8   :  { %1857 = vmatmul.msk.bf16.vlgmr.msra.gmra.mxu0 %vm129_vm1, %v2160_v15  ;;  %1859 = vmatmul.msk.bf16.vlgmr.msra.gmra.mxu1 %vm129_vm1, %v2160_v15  ;;  %v37_v30 = vld [vmem:[%s3164_s1 + $0x58] sm:$0xff]  ;;  %v87_v33 = vld [vmem:[%s3164_s1 + $0x1e8] sm:$0xff]  ;;  %v36_v34 = vld [vmem:[%s3164_s1 + $0x50] sm:$0xff]  ;;  %v2265_v44 = vpack.c.bf16 %v2205_v25, %v2147_v11 }
   0x9   :  { %241 = vmatpush.msrb.mxu0 %v41_v16  ;;  %270 = vmatpush.msrb.mxu1 %v57_v17  ;;  %v53_v32 = vld [vmem:[%s3164_s1 + $0xd8] sm:$0xff]  ;;  %v70_v35 = vld [vmem:[%s3164_s1 + $0x160] sm:$0xff]  ;;  %v52_v36 = vld [vmem:[%s3164_s1 + $0xd0] sm:$0xff] }
   0xa   :  { %1861 = vmatmul.msk.bf16.vlgmr.msra.gmra.mxu2 %vm129_vm1, %v2160_v15  ;;  %1863 = vmatmul.msk.bf16.vlgmr.msra.gmra.mxu3 %vm129_vm1, %v2160_v15  ;;  %v86_v37 = vld [vmem:[%s3164_s1 + $0x1e0] sm:$0xff]  ;;  %v35_v38 = vld [vmem:[%s3164_s1 + $0x48] sm:$0xff]  ;;  %v69_v39 = vld [vmem:[%s3164_s1 + $0x158] sm:$0xff]  ;;  %3182 = vst [vmem:[#allocation3_spill] sm:$0xff] %v2265_v44 }
   0xb   :  { %242 = vmatpush.msrb.mxu0 %v40_v19  ;;  %271 = vmatpush.msrb.mxu1 %v56_v20  ;;  %v51_v40 = vld [vmem:[%s3164_s1 + $0xc8] sm:$0xff]  ;;  %v85_v41 = vld [vmem:[%s3164_s1 + $0x1d8] sm:$0xff]  ;;  %v34_v42 = vld [vmem:[%s3164_s1 + $0x40] sm:$0xff] }
   0xc   :  { %116 = vperm.xlu0 %1980, %v2139_v9   ;;  %299 = vmatpush.msrb.mxu2 %v73_v21  ;;  %v68_v43 = vld [vmem:[%s3164_s1 + $0x150] sm:$0xff]  ;;  %v50_v45 = vld [vmem:[%s3164_s1 + $0xc0] sm:$0xff]  ;;  %v33_v47 = vld [vmem:[%s3164_s1 + $0x38] sm:$0xff] }
   0xd   :  { %126 = vperm.xlu1 %1981, %v2205_v25   ;;  %243 = vmatpush.msrb.mxu0 %v39_v22  ;;  %v84_v46 = vld [vmem:[%s3164_s1 + $0x1d0] sm:$0xff]  ;;  %v49_v48 = vld [vmem:[%s3164_s1 + $0xb8] sm:$0xff]  ;;  %v67_v49 = vld [vmem:[%s3164_s1 + $0x148] sm:$0xff] }
   0xe   :  { %272 = vmatpush.msrb.mxu1 %v55_v23  ;;  %328 = vmatpush.msrb.mxu3 %v89_v24  ;;  %v83_v50 = vld [vmem:[%s3164_s1 + $0x1c8] sm:$0xff]  ;;  %v32_v51 = vld [vmem:[%s3164_s1 + $0x30] sm:$0xff]  ;;  %v66_v53 = vld [vmem:[%s3164_s1 + $0x140] sm:$0xff] }
   0xf   :  { %244 = vmatpush.msrb.mxu0 %v38_v26  ;;  %300 = vmatpush.msrb.mxu2 %v72_v27  ;;  %v48_v52 = vld [vmem:[%s3164_s1 + $0xb0] sm:$0xff]  ;;  %v82_v54 = vld [vmem:[%s3164_s1 + $0x1c0] sm:$0xff]  ;;  %v31_v55 = vld [vmem:[%s3164_s1 + $0x28] sm:$0xff] }
  0x10   :  { %273 = vmatpush.msrb.mxu1 %v54_v28  ;;  %329 = vmatpush.msrb.mxu3 %v88_v29  ;;  %v47_v56 = vld [vmem:[%s3164_s1 + $0xa8] sm:$0xff]  ;;  %v65_v57 = vld [vmem:[%s3164_s1 + $0x138] sm:$0xff]  ;;  %v30_v59 = vld [vmem:[%s3164_s1 + $0x20] sm:$0xff] }
  0x11   :  { %245 = vmatpush.msrb.mxu0 %v37_v30  ;;  %301 = vmatpush.msrb.mxu2 %v71_v31  ;;  %v81_v58 = vld [vmem:[%s3164_s1 + $0x1b8] sm:$0xff]  ;;  %v46_v60 = vld [vmem:[%s3164_s1 + $0xa0] sm:$0xff]  ;;  %v64_v63 = vld [vmem:[%s3164_s1 + $0x130] sm:$0xff] }
  0x12   :  { %274 = vmatpush.msrb.mxu1 %v53_v32  ;;  %330 = vmatpush.msrb.mxu3 %v87_v33  ;;  %v29_v61 = vld [vmem:[%s3164_s1 + $0x18] sm:$0xff]  ;;  %v80_v3 = vld [vmem:[%s3164_s1 + $0x1b0] sm:$0xff]  ;;  %v63_v6 = vld [vmem:[%s3164_s1 + $0x128] sm:$0xff] }
  0x13   :  { %246 = vmatpush.msrb.mxu0 %v36_v34  ;;  %302 = vmatpush.msrb.mxu2 %v70_v35  ;;  %v45_v62 = vld [vmem:[%s3164_s1 + $0x98] sm:$0xff]  ;;  %v28_v4 = vld [vmem:[%s3164_s1 + $0x10] sm:$0xff]  ;;  %v79_v10 = vld [vmem:[%s3164_s1 + $0x1a8] sm:$0xff] }
  0x14   :  { %275 = vmatpush.msrb.mxu1 %v52_v36  ;;  %331 = vmatpush.msrb.mxu3 %v86_v37  ;;  %v44_v5 = vld [vmem:[%s3164_s1 + $0x90] sm:$0xff]  ;;  %v27_v16 = vld [vmem:[%s3164_s1 + $0x8] sm:$0xff]  ;;  %v62_v19 = vld [vmem:[%s3164_s1 + $0x120] sm:$0xff] }
  0x15   :  { %247 = vmatpush.msrb.mxu0 %v35_v38  ;;  %303 = vmatpush.msrb.mxu2 %v69_v39  ;;  %v43_v17 = vld [vmem:[%s3164_s1 + $0x88] sm:$0xff]  ;;  %v78_v20 = vld [vmem:[%s3164_s1 + $0x1a0] sm:$0xff]  ;;  %v61_v23 = vld [vmem:[%s3164_s1 + $0x118] sm:$0xff] }
  0x16   :  { %276 = vmatpush.msrb.mxu1 %v51_v40  ;;  %332 = vmatpush.msrb.mxu3 %v85_v41  ;;  %v26_v21 = vld [vmem:[%s3164_s1] sm:$0xff]  ;;  %v77_v24 = vld [vmem:[%s3164_s1 + $0x198] sm:$0xff]  ;;  %v60_v26 = vld [vmem:[%s3164_s1 + $0x110] sm:$0xff] }
  0x17   :  { %248 = vmatpush.msrb.mxu0 %v34_v42  ;;  %304 = vmatpush.msrb.mxu2 %v68_v43  ;;  %v42_v22 = vld [vmem:[%s3164_s1 + $0x80] sm:$0xff]  ;;  %v76_v27 = vld [vmem:[%s3164_s1 + $0x190] sm:$0xff]  ;;  %v59_v28 = vld [vmem:[%s3164_s1 + $0x108] sm:$0xff] }
  0x18   :  { %277 = vmatpush.msrb.mxu1 %v50_v45  ;;  %333 = vmatpush.msrb.mxu3 %v84_v46  ;;  %v75_v29 = vld [vmem:[%s3164_s1 + $0x188] sm:$0xff]  ;;  %v58_v30 = vld [vmem:[%s3164_s1 + $0x100] sm:$0xff] }
  0x19   :  { %1858 = vmatmul.msk.bf16.gmra.mxu0 %vm129_vm1, %v2265_v44  ;;  %1860 = vmatmul.msk.bf16.gmra.mxu1 %vm129_vm1, %v2265_v44  ;;  %v74_v31 = vld [vmem:[%s3164_s1 + $0x180] sm:$0xff] }
  0x1a   :  { %1862 = vmatmul.msk.bf16.gmra.mxu2 %vm129_vm1, %v2265_v44  ;;  %1864 = vmatmul.msk.bf16.gmra.mxu3 %vm129_vm1, %v2265_v44 }
  0x1b   :  { %249 = vmatpush.msrb.mxu0 %v33_v47  ;;  %278 = vmatpush.msrb.mxu1 %v49_v48 }
  0x1c   :  { %305 = vmatpush.msrb.mxu2 %v67_v49  ;;  %334 = vmatpush.msrb.mxu3 %v83_v50 }
  0x1d   :  { %250 = vmatpush.msrb.mxu0 %v32_v51  ;;  %279 = vmatpush.msrb.mxu1 %v48_v52 }
  0x1e   :  { %306 = vmatpush.msrb.mxu2 %v66_v53  ;;  %335 = vmatpush.msrb.mxu3 %v82_v54 }
  0x1f   :  { %251 = vmatpush.msrb.mxu0 %v31_v55  ;;  %280 = vmatpush.msrb.mxu1 %v47_v56 }
  0x20   :  { %307 = vmatpush.msrb.mxu2 %v65_v57  ;;  %336 = vmatpush.msrb.mxu3 %v81_v58 }
  0x21   :  { %252 = vmatpush.msrb.mxu0 %v30_v59  ;;  %281 = vmatpush.msrb.mxu1 %v46_v60 }
  0x22   :  { %308 = vmatpush.msrb.mxu2 %v64_v63  ;;  %337 = vmatpush.msrb.mxu3 %v80_v3 }
  0x23   :  { %253 = vmatpush.msrb.mxu0 %v29_v61  ;;  %282 = vmatpush.msrb.mxu1 %v45_v62 }
  0x24   :  { %309 = vmatpush.msrb.mxu2 %v63_v6  ;;  %338 = vmatpush.msrb.mxu3 %v79_v10 }
  0x25   :  { %254 = vmatpush.msrb.mxu0 %v28_v4  ;;  %283 = vmatpush.msrb.mxu1 %v44_v5 }
  0x26   :  { %310 = vmatpush.msrb.mxu2 %v62_v19  ;;  %339 = vmatpush.msrb.mxu3 %v78_v20 }
  0x27   :  { %255 = vmatpush.msrb.mxu0 %v27_v16  ;;  %284 = vmatpush.msrb.mxu1 %v43_v17 }
  0x28   :  { %311 = vmatpush.msrb.mxu2 %v61_v23  ;;  %340 = vmatpush.msrb.mxu3 %v77_v24 }
  0x29   :  { %256 = vmatpush.msrb.mxu0 %v26_v21  ;;  %285 = vmatpush.msrb.mxu1 %v42_v22 }
  0x2a   :  { %312 = vmatpush.msrb.mxu2 %v60_v26  ;;  %341 = vmatpush.msrb.mxu3 %v76_v27 }
  0x2b   :  { %544 = vrot.lane.b32.xlu2 %v2265_v44, %s2072_s29 }
  0x2c   :  { %313 = vmatpush.msrb.mxu2 %v59_v28  ;;  %342 = vmatpush.msrb.mxu3 %v75_v29 }
  0x2e   :  { %314 = vmatpush.msrb.mxu2 %v58_v30  ;;  %343 = vmatpush.msrb.mxu3 %v74_v31 }
  0x75   :  { %v2389_v32 = vpop.permute.xlu0 %111 }
  0x76   :  { %3183 = vst [vmem:[#allocation4_spill] sm:$0xff] %v2389_v32  ;;  %v2399_v53 = vpop.permute.xlu1 %121 }
  0x77   :  { %3185 = vst [vmem:[#allocation6_spill] sm:$0xff] %v2399_v53 }
  0x7e   :  { %v2393_v39 = vpop.permute.xlu0 %116 }
  0x7f   :  { %3184 = vst [vmem:[#allocation5_spill] sm:$0xff] %v2393_v39  ;;  %v2405_v5 = vpop.permute.xlu1 %126 }
  0x80   :  { %3186 = vst [vmem:[#allocation7_spill] sm:$0xff] %v2405_v5 }
  0x85   :  { %v158_v33 = vpop.f32.mrf.mxu0  ;;  %v177_v34 = vpop.f32.mrf.mxu1 }
  0x86   :  { %v159_v35 = vadd.f32 %v158_v33, %v2389_v32  ;;  %v178_v36 = vadd.f32 %v177_v34, %v2389_v32 }
  0x88   :  { %v225_v37 = vmax.f32 %v159_v35, 0.0  ;;  %v226_v38 = vmax.f32 %v178_v36, 0.0 }
  0x8a   :  { %257 = vmatmul.f32.vlgmr.msrb.gmra.mxu0 %v225_v37  ;;  %286 = vmatmul.f32.vlgmr.msrb.gmra.mxu1 %v226_v38 }
  0x8d   :  { %v196_v40 = vpop.f32.mrf.mxu2  ;;  %v215_v41 = vpop.f32.mrf.mxu3 }
  0x8e   :  { %v197_v42 = vadd.f32 %v196_v40, %v2389_v32  ;;  %v216_v43 = vadd.f32 %v215_v41, %v2389_v32  ;;  %v160_v45 = vpop.f32.mrf.mxu0  ;;  %v179_v46 = vpop.f32.mrf.mxu1 }
  0x8f   :  { %v161_v47 = vadd.f32 %v160_v45, %v2393_v39  ;;  %v180_v48 = vadd.f32 %v179_v46, %v2393_v39 }
  0x90   :  { %v227_v49 = vmax.f32 %v197_v42, 0.0  ;;  %v228_v50 = vmax.f32 %v216_v43, 0.0 }
  0x91   :  { %v229_v51 = vmax.f32 %v161_v47, 0.0  ;;  %v230_v52 = vmax.f32 %v180_v48, 0.0 }
  0x92   :  { %315 = vmatmul.f32.vlgmr.msrb.gmra.mxu2 %v227_v49  ;;  %344 = vmatmul.f32.vlgmr.msrb.gmra.mxu3 %v228_v50 }
  0x93   :  { %260 = vmatmul.f32.gmra.mxu0 %v229_v51  ;;  %289 = vmatmul.f32.gmra.mxu1 %v230_v52  ;;  %v23_v52 = vld [vmem:[%s3162_s0 + $0x8] sm:$0x30] }
  0x95   :  { %v198_v54 = vpop.f32.mrf.mxu2  ;;  %v217_v55 = vpop.f32.mrf.mxu3 }
  0x96   :  { %v199_v56 = vadd.f32 %v198_v54, %v2393_v39  ;;  %v218_v57 = vadd.f32 %v217_v55, %v2393_v39  ;;  %v163_v58 = vpop.f32.mrf.mxu0  ;;  %v182_v59 = vpop.f32.mrf.mxu1 }
  0x97   :  { %v164_v60 = vadd.f32 %v163_v58, %v2399_v53  ;;  %v183_v61 = vadd.f32 %v182_v59, %v2399_v53 }
  0x98   :  { %v231_v62 = vmax.f32 %v199_v56, 0.0  ;;  %v232_v63 = vmax.f32 %v218_v57, 0.0  ;;  %v400_v57 = vrot.slane %v23_v52, 4 }
  0x99   :  { %v233_v3 = vmax.f32 %v164_v60, 0.0  ;;  %v234_v4 = vmax.f32 %v183_v61, 0.0 }
  0x9a   :  { %318 = vmatmul.f32.gmra.mxu2 %v231_v62  ;;  %347 = vmatmul.f32.gmra.mxu3 %v232_v63 }
  0x9b   :  { %263 = vmatmul.f32.gmra.mxu0 %v233_v3  ;;  %292 = vmatmul.f32.gmra.mxu1 %v234_v4 }
  0x9c   :  { %1880 = vmatpush.msk.msra.mxu2 %vm136_vm0, %v400_v57 }
  0x9d   :  { %v201_v6 = vpop.f32.mrf.mxu2  ;;  %v220_v10 = vpop.f32.mrf.mxu3 }
  0x9e   :  { %v202_v16 = vadd.f32 %v201_v6, %v2399_v53  ;;  %v221_v17 = vadd.f32 %v220_v10, %v2399_v53  ;;  %v165_v19 = vpop.f32.mrf.mxu0  ;;  %v184_v20 = vpop.f32.mrf.mxu1  ;;  %578 = vmatpush.bf16.msrb.mxu2 %v2153_v13  ;;  %v1969_v13 = vld [vmem:[%s3165_s2 + $0x8] sm:$0xff] }
  0x9f   :  { %v166_v21 = vadd.f32 %v165_v19, %v2405_v5  ;;  %v185_v22 = vadd.f32 %v184_v20, %v2405_v5  ;;  %v1968_v19 = vld [vmem:[%s3165_s2] sm:$0xff] }
  0xa0   :  { %v235_v23 = vmax.f32 %v202_v16, 0.0  ;;  %v236_v24 = vmax.f32 %v221_v17, 0.0  ;;  %v22_v20 = vld [vmem:[%s3162_s0] sm:$0x30] }
  0xa1   :  { %v237_v26 = vmax.f32 %v166_v21, 0.0  ;;  %v238_v27 = vmax.f32 %v185_v22, 0.0  ;;  %v24_v21 = vld [vmem:[%s3162_s0 + $0x10] sm:$0x30]  ;;  %v25_v22 = vld [vmem:[%s3162_s0 + $0x18] sm:$0x30] }
  0xa2   :  { %321 = vmatmul.f32.gmra.mxu2 %v235_v23  ;;  %350 = vmatmul.f32.gmra.mxu3 %v236_v24  ;;  %v399_v23 = vrot.slane %v22_v20, 4  ;;  %v401_v24 = vrot.slane %v24_v21, 4 }
  0xa3   :  { %266 = vmatmul.f32.gmra.mxu0 %v237_v26  ;;  %295 = vmatmul.f32.gmra.mxu1 %v238_v27  ;;  %v402_v26 = vrot.slane %v25_v22, 4  ;;  %v2074_v22 = vmov 14  }
  0xa4   :  { %1875 = vmatpush.msk.msra.mxu1 %vm136_vm0, %v399_v23  ;;  %1885 = vmatpush.msk.msra.mxu3 %vm136_vm0, %v401_v24 }
  0xa5   :  { %v203_v28 = vpop.f32.mrf.mxu2  ;;  %v222_v29 = vpop.f32.mrf.mxu3 }
  0xa6   :  { %v204_v30 = vadd.f32 %v203_v28, %v2405_v5  ;;  %v223_v31 = vadd.f32 %v222_v29, %v2405_v5  ;;  %559 = vmatpush.bf16.msrb.mxu1 %v2150_v12  ;;  %597 = vmatpush.bf16.msrb.mxu3 %v2156_v14  ;;  %v2073_v28 = vmov 9   ;;  %v2463_v29 = vpop.permute.xlu2 %542 }
  0xa7   :  { %1983 = vset.pattern.permute.xlu1 %v2073_v28  ;;  %1982 = vset.pattern.permute.xlu0 %v2073_v28 }
  0xa8   :  { %v239_v33 = vmax.f32 %v204_v30, 0.0  ;;  %v240_v34 = vmax.f32 %v223_v31, 0.0  ;;  %641 = vperm.xlu1 %1983, %v2205_v25   ;;  %637 = vperm.xlu0 %1982, %v2147_v11  }
  0xa9   :  { %1984 = vset.pattern.permute.xlu2 %v2073_v28 }
  0xaa   :  { %324 = vmatmul.f32.gmra.mxu2 %v239_v33  ;;  %353 = vmatmul.f32.gmra.mxu3 %v240_v34 }
  0xab   :  { %629 = vperm.xlu2 %1984, %v2134_v8  }
  0xae   :  { %v2473_v30 = vpop.permute.xlu2 %544 }
  0xb0   :  { %633 = vperm.xlu1 %1983, %v2139_v9  }
  0xb3   :  { %1985 = vset.pattern.permute.xlu2 %v2074_v22 }
 0x105   :  { %v630_v23 = vpop.permute.xlu2 %629 }
 0x107   :  { %v258_v35 = vpop.f32.mrf.mxu0  ;;  %v287_v36 = vpop.f32.mrf.mxu1 }
 0x108   :  { %v288_v59 = vadd.f32 %v287_v36, %v258_v35 }
 0x110   :  { %v261_v37 = vpop.f32.mrf.mxu0  ;;  %v290_v38 = vpop.f32.mrf.mxu1 }
 0x111   :  { %v291_v54 = vadd.f32 %v290_v38, %v261_v37 }
 0x115   :  { %v316_v40 = vpop.f32.mrf.mxu2  ;;  %v345_v41 = vpop.f32.mrf.mxu3 }
 0x116   :  { %v317_v63 = vadd.f32 %v316_v40, %v288_v59 }
 0x118   :  { %v264_v45 = vpop.f32.mrf.mxu0  ;;  %v293_v46 = vpop.f32.mrf.mxu1  ;;  %v346_v16 = vadd.f32 %v345_v41, %v317_v63 }
 0x119   :  { %v294_v51 = vadd.f32 %v293_v46, %v264_v45 }
 0x11a   :  { %v642_v57 = vpop.permute.xlu1 %641  ;;  %v638_v63 = vpop.permute.xlu0 %637 }
 0x11d   :  { %v319_v42 = vpop.f32.mrf.mxu2  ;;  %v348_v43 = vpop.f32.mrf.mxu3 }
 0x11e   :  { %v320_v60 = vadd.f32 %v319_v42, %v291_v54 }
 0x120   :  { %v267_v49 = vpop.f32.mrf.mxu0  ;;  %v296_v50 = vpop.f32.mrf.mxu1  ;;  %v349_v6 = vadd.f32 %v348_v43, %v320_v60 }
 0x121   :  { %v297_v55 = vadd.f32 %v296_v50, %v267_v49 }
 0x122   :  { %v357_v17 = vpack.c.bf16 %v349_v6, %v346_v16 }
 0x125   :  { %v322_v47 = vpop.f32.mrf.mxu2  ;;  %v351_v48 = vpop.f32.mrf.mxu3 }
 0x126   :  { %v323_v56 = vadd.f32 %v322_v47, %v294_v51 }
 0x128   :  { %v352_v3 = vadd.f32 %v351_v48, %v323_v56 }
 0x12d   :  { %v325_v58 = vpop.f32.mrf.mxu2  ;;  %v354_v62 = vpop.f32.mrf.mxu3 }
 0x12e   :  { %v326_v61 = vadd.f32 %v325_v58, %v297_v55 }
 0x130   :  { %v355_v4 = vadd.f32 %v354_v62, %v326_v61 }
 0x132   :  { %v358_v10 = vpack.c.bf16 %v355_v4, %v352_v3 }
 0x134   :  { %382 = vmatpush.bf16.msra.mxu0 %v358_v10  ;;  %v634_v10 = vpop.permute.xlu1 %633 }
 0x138   :  { %383 = vmatpush.bf16.msra.mxu0 %v357_v17  ;;  %v103_v17 = vld [vmem:[%s3163_s3] sm:$0xf] }
 0x139   :  { %745 = vperm.xlu2 %1985, %v103_v17  }
 0x13b   :  { %1873 = vmatmul.msk.bf16.vlgmr.msra.gmra.mxu0 %vm369_vm2, %v1968_v19 }
 0x13c   :  { %1890 = vmatpush.msk.msrb.mxu0 %vm136_vm0, %v402_v26 }
 0x13e   :  { %616 = vmatpush.bf16.msra.mxu0 %v2172_v18 }
 0x14b   :  { %1874 = vmatmul.msk.bf16.gmra.mxu0 %vm369_vm2, %v1969_v13 }
 0x1b8   :  { %v385_v27 = vpop.f32.mrf.mxu0 }
 0x1b9   :  { %1876 = vmatmul.msk.f32.vlgmr.msra.gmra.mxu1 %vm403_vm3, %v385_v27  ;;  %1881 = vmatmul.msk.f32.vlgmr.msra.gmra.mxu2 %vm403_vm3, %v385_v27 }
 0x1ba   :  { %1886 = vmatmul.msk.f32.vlgmr.msra.gmra.mxu3 %vm403_vm3, %v385_v27  ;;  %1891 = vmatmul.msk.f32.vlgmr.msrb.gmra.mxu0 %vm403_vm3, %v385_v27 }
 0x1c0   :  { %v387_v12 = vpop.f32.mrf.mxu0 }
 0x1c1   :  { %1877 = vmatmul.msk.f32.gmra.mxu1 %vm403_vm3, %v387_v12  ;;  %1882 = vmatmul.msk.f32.gmra.mxu2 %vm403_vm3, %v387_v12 }
 0x1c2   :  { %1887 = vmatmul.msk.f32.gmra.mxu3 %vm403_vm3, %v387_v12  ;;  %1892 = vmatmul.msk.f32.gmra.mxu0 %vm403_vm3, %v387_v12 }
 0x1c8   :  { %v390_v14 = vpop.f32.mrf.mxu0 }
 0x1c9   :  { %1878 = vmatmul.msk.f32.gmra.mxu1 %vm403_vm3, %v390_v14  ;;  %1883 = vmatmul.msk.f32.gmra.mxu2 %vm403_vm3, %v390_v14 }
 0x1ca   :  { %1888 = vmatmul.msk.f32.gmra.mxu3 %vm403_vm3, %v390_v14  ;;  %1893 = vmatmul.msk.f32.gmra.mxu0 %vm403_vm3, %v390_v14 }
 0x1d0   :  { %v392_v18 = vpop.f32.mrf.mxu0 }
 0x1d1   :  { %1879 = vmatmul.msk.f32.gmra.mxu1 %vm403_vm3, %v392_v18  ;;  %1884 = vmatmul.msk.f32.gmra.mxu2 %vm403_vm3, %v392_v18 }
 0x1d2   :  { %1889 = vmatmul.msk.f32.gmra.mxu3 %vm403_vm3, %v392_v18  ;;  %1894 = vmatmul.msk.f32.gmra.mxu0 %vm403_vm3, %v392_v18 }
 0x1d9   :  { %1895 = vmatmul.msk.bf16.vlgmr.msrb.gmra.mxu1 %vm129_vm1, %v2463_v29  ;;  %1897 = vmatmul.msk.bf16.vlgmr.msrb.gmra.mxu2 %vm129_vm1, %v2463_v29 }
 0x1da   :  { %1899 = vmatmul.msk.bf16.vlgmr.msrb.gmra.mxu3 %vm129_vm1, %v2463_v29  ;;  %1901 = vmatmul.msk.bf16.vlgmr.msra.gmra.mxu0 %vm129_vm1, %v2463_v29 }
 0x1e9   :  { %1896 = vmatmul.msk.bf16.gmra.mxu1 %vm129_vm1, %v2473_v30  ;;  %1898 = vmatmul.msk.bf16.gmra.mxu2 %vm129_vm1, %v2473_v30 }
 0x1ea   :  { %1900 = vmatmul.msk.bf16.gmra.mxu3 %vm129_vm1, %v2473_v30  ;;  %1902 = vmatmul.msk.bf16.gmra.mxu0 %vm129_vm1, %v2473_v30 }
 0x236   :  { %v2483_v31 = vpop.f32.mrf.mxu1 }
 0x237   :  { %3187 = vst [vmem:[#allocation8_spill] sm:$0xff] %v2483_v31  ;;  %v2485_v33 = vpop.f32.mrf.mxu0 }
 0x23c   :  { %v2487_v34 = vpop.f32.mrf.mxu2 }
 0x23d   :  { %v2489_v35 = vpop.f32.mrf.mxu3 }
 0x23e   :  { %v2491_v36 = vpop.f32.mrf.mxu1 }
 0x23f   :  { %v2493_v37 = vpop.f32.mrf.mxu0 }
 0x244   :  { %v2495_v38 = vpop.f32.mrf.mxu2 }
 0x245   :  { %v2497_v40 = vpop.f32.mrf.mxu3 }
 0x246   :  { %v2499_v41 = vpop.f32.mrf.mxu1 }
 0x247   :  { %v2501_v42 = vpop.f32.mrf.mxu0 }
 0x24c   :  { %v2503_v43 = vpop.f32.mrf.mxu2 }
 0x24d   :  { %v2505_v45 = vpop.f32.mrf.mxu3 }
 0x24e   :  { %v2507_v46 = vpop.f32.mrf.mxu1 }
 0x24f   :  { %v2509_v47 = vpop.f32.mrf.mxu0 }
 0x254   :  { %v2511_v48 = vpop.f32.mrf.mxu2 }
 0x255   :  { %v2513_v49 = vpop.f32.mrf.mxu3 }
 0x256   :  { %v561_v50 = vpop.f32.mrf.mxu1 }
 0x257   :  { %v618_v51 = vpop.f32.mrf.mxu0  ;;  %v562_v19 = vadd.f32 %v561_v50, %v2483_v31 }
 0x258   :  { %v619_v14 = vadd.f32 %v618_v51, %v2485_v33 }
 0x25c   :  { %v580_v52 = vpop.f32.mrf.mxu2 }
 0x25d   :  { %v599_v54 = vpop.f32.mrf.mxu3 }
 0x25e   :  { %v563_v55 = vpop.f32.mrf.mxu1  ;;  %v600_v17 = vadd.f32 %v599_v54, %v2489_v35 }
 0x25f   :  { %v620_v56 = vpop.f32.mrf.mxu0  ;;  %v564_v4 = vadd.f32 %v563_v55, %v2491_v36 }
 0x260   :  { %v621_v18 = vadd.f32 %v620_v56, %v2493_v37 }
 0x261   :  { %v648_v27 = vadd.f32 %v634_v10, %v564_v4 }
 0x264   :  { %v582_v58 = vpop.f32.mrf.mxu2 }
 0x265   :  { %v601_v59 = vpop.f32.mrf.mxu3 }
 0x266   :  { %v566_v60 = vpop.f32.mrf.mxu1  ;;  %v602_v4 = vadd.f32 %v601_v59, %v2497_v40 }
 0x267   :  { %v623_v61 = vpop.f32.mrf.mxu0  ;;  %v567_v62 = vadd.f32 %v566_v60, %v2499_v41  ;;  %v644_v60 = vadd.f32 %v630_v23, %v562_v19 }
 0x268   :  { %v624_v24 = vadd.f32 %v623_v61, %v2501_v42  ;;  %v581_v61 = vadd.f32 %v580_v52, %v2487_v34  ;;  %v650_v59 = vadd.f32 %v634_v10, %v602_v4 }
 0x269   :  { %v652_v13 = vadd.f32 %v638_v63, %v567_v62  ;;  %v583_v62 = vadd.f32 %v582_v58, %v2495_v38  ;;  %v660_v54 = vmax.f32 %v644_v60, 0.0 }
 0x26a   :  { %v645_v39 = vadd.f32 %v630_v23, %v581_v61  ;;  %v2550_v61 = vpop.permute.xlu2 %745 }
 0x26c   :  { %v585_v3 = vpop.f32.mrf.mxu2 }
 0x26d   :  { %v604_v6 = vpop.f32.mrf.mxu3  ;;  %v586_v28 = vadd.f32 %v585_v3, %v2503_v43  ;;  %v655_v3 = vadd.f32 %v638_v63, %v624_v24 }
 0x26e   :  { %v568_v16 = vpop.f32.mrf.mxu1  ;;  %v605_v50 = vadd.f32 %v604_v6, %v2505_v45  ;;  %v664_v6 = vmax.f32 %v648_v27, 0.0 }
 0x26f   :  { %v569_v20 = vadd.f32 %v568_v16, %v2507_v46  ;;  %v625_v21 = vpop.f32.mrf.mxu0  ;;  %v668_v16 = vmax.f32 %v652_v13, 0.0  ;;  %v647_v13 = vadd.f32 %v630_v23, %v619_v14  ;;  %v671_v24 = vmax.f32 %v655_v3, 0.0 }
 0x270   :  { %v626_v26 = vadd.f32 %v625_v21, %v2509_v47  ;;  %v653_v21 = vadd.f32 %v638_v63, %v586_v28  ;;  %v654_v19 = vadd.f32 %v638_v63, %v605_v50  ;;  %v646_v28 = vadd.f32 %v630_v23, %v600_v17 }
 0x271   :  { %v656_v12 = vadd.f32 %v642_v57, %v569_v20  ;;  %v661_v23 = vmax.f32 %v645_v39, 0.0 }
 0x272   :  { %v659_v55 = vadd.f32 %v642_v57, %v626_v26  ;;  %v651_v26 = vadd.f32 %v634_v10, %v621_v18  ;;  %v670_v44 = vmax.f32 %v654_v19, 0.0  ;;  %v662_v60 = vmax.f32 %v646_v28, 0.0 }
 0x273   :  { %v672_v22 = vmax.f32 %v656_v12, 0.0  ;;  %v649_v12 = vadd.f32 %v634_v10, %v583_v62 }
 0x274   :  { %v587_v20 = vpop.f32.mrf.mxu2  ;;  %v675_v53 = vmax.f32 %v659_v55, 0.0  ;;  %v667_v63 = vmax.f32 %v651_v26, 0.0  ;;  %v666_v55 = vmax.f32 %v650_v59, 0.0 }
 0x275   :  { %v680_v51 = vpack.c.bf16 %v672_v22, %v668_v16  ;;  %v588_v56 = vadd.f32 %v587_v20, %v2511_v48  ;;  %v606_v5 = vpop.f32.mrf.mxu3  ;;  %v669_v16 = vmax.f32 %v653_v21, 0.0  ;;  %v676_v20 = vpack.c.bf16 %v664_v6, %v660_v54 }
 0x276   :  { %v607_v58 = vadd.f32 %v606_v5, %v2513_v49  ;;  %v683_v27 = vpack.c.bf16 %v675_v53, %v671_v24  ;;  %v2537_v5 = vld [vmem:[%s3165_s2 + $0x10] sm:$0x3]  ;;  %v665_v14 = vmax.f32 %v649_v12, 0.0  ;;  %v678_v62 = vpack.c.bf16 %v666_v55, %v662_v60 }
 0x277   :  { %v657_v52 = vadd.f32 %v642_v57, %v588_v56  ;;  %693 = vmatpush.bf16.msra.mxu1 %v680_v51 }
 0x278   :  { %v658_v32 = vadd.f32 %v642_v57, %v607_v58  ;;  %v663_v57 = vmax.f32 %v647_v13, 0.0  ;;  %v677_v53 = vpack.c.bf16 %v665_v14, %v661_v23 }
 0x279   :  { %v673_v22 = vmax.f32 %v657_v52, 0.0 }
 0x27a   :  { %v674_v18 = vmax.f32 %v658_v32, 0.0  ;;  %v679_v32 = vpack.c.bf16 %v667_v63, %v663_v57 }
 0x27b   :  { %v681_v50 = vpack.c.bf16 %v673_v22, %v669_v16  ;;  %694 = vmatpush.bf16.msra.mxu1 %v676_v20 }
 0x27c   :  { %v682_v10 = vpack.c.bf16 %v674_v18, %v670_v44  ;;  %v2075_v44 = vmov 10  }
 0x27d   :  { %706 = vmatpush.bf16.msra.mxu2 %v681_v50  ;;  %1987 = vset.pattern.permute.xlu1 %v2075_v44 }
 0x27e   :  { %719 = vmatpush.bf16.msra.mxu3 %v682_v10  ;;  %1903 = vmatmul.msk.bf16.vlgmr.msra.gmra.mxu1 %vm369_vm2, %v2537_v5 }
 0x27f   :  { %732 = vmatpush.bf16.msrb.mxu1 %v683_v27  ;;  %1986 = vset.pattern.permute.xlu0 %v2075_v44 }
 0x280   :  { %857 = vperm.xlu1 %1987, %v2205_v25   ;;  %853 = vperm.xlu0 %1986, %v2147_v11  }
 0x281   :  { %707 = vmatpush.bf16.msra.mxu2 %v677_v53  ;;  %1988 = vset.pattern.permute.xlu2 %v2075_v44 }
 0x282   :  { %720 = vmatpush.bf16.msra.mxu3 %v678_v62  ;;  %845 = vperm.xlu2 %1988, %v2134_v8  }
 0x283   :  { %733 = vmatpush.bf16.msrb.mxu1 %v679_v32 }
 0x284   :  { %1904 = vmatmul.msk.bf16.vlgmr.msra.gmra.mxu2 %vm369_vm2, %v2537_v5 }
 0x285   :  { %1905 = vmatmul.msk.bf16.vlgmr.msra.gmra.mxu3 %vm369_vm2, %v2537_v5 }
 0x288   :  { %849 = vperm.xlu1 %1987, %v2139_v9  }
 0x28e   :  { %1906 = vmatmul.msk.bf16.vlgmr.msrb.gmra.mxu1 %vm369_vm2, %v2537_v5 }
 0x2f2   :  { %v858_v27 = vpop.permute.xlu1 %857  ;;  %v854_v10 = vpop.permute.xlu0 %853 }
 0x2fa   :  { %v850_v60 = vpop.permute.xlu1 %849 }
 0x2fb   :  { %v696_v39 = vpop.f32.mrf.mxu1 }
 0x2fc   :  { %v739_v17 = vadd.f32 %v696_v39, %v2108_v0  ;;  %v846_v39 = vpop.permute.xlu2 %845 }
 0x2fe   :  { %v2554_v4 = vadd.f32 %v2550_v61, %v739_v17 }
 0x300   :  { %v752_v3 = vpack.c.bf16 %v2554_v4, %v2554_v4 }
 0x302   :  { %v757_v25 = vsel %vm136_vm0, %v752_v3, 0 }
 0x303   :  { %v698_v21 = vpop.f32.mrf.mxu1  ;;  %775 = vmatpush.bf16.msrb.mxu2 %v757_v25 }
 0x306   :  { %1907 = vmatmul.msk.bf16.vlgmr.msrb.gmra.mxu2 %vm129_vm1, %v2463_v29 }
 0x307   :  { %v709_v8 = vpop.f32.mrf.mxu2 }
 0x308   :  { %v740_v11 = vadd.f32 %v709_v8, %v2113_v1  ;;  %v722_v51 = vpop.f32.mrf.mxu3 }
 0x309   :  { %v741_v0 = vadd.f32 %v722_v51, %v2118_v2 }
 0x30a   :  { %v2565_v56 = vadd.f32 %v2550_v61, %v740_v11 }
 0x30b   :  { %v2568_v6 = vadd.f32 %v2550_v61, %v741_v0  ;;  %v735_v9 = vpop.f32.mrf.mxu1 }
 0x30c   :  { %v753_v26 = vpack.c.bf16 %v2565_v56, %v2565_v56  ;;  %v742_v19 = vadd.f32 %v735_v9, %v2129_v7 }
 0x30d   :  { %v754_v58 = vpack.c.bf16 %v2568_v6, %v2568_v6 }
 0x30e   :  { %v2576_v1 = vadd.f32 %v2550_v61, %v742_v19  ;;  %v760_v2 = vsel %vm136_vm0, %v753_v26, 0 }
 0x30f   :  { %v711_v13 = vpop.f32.mrf.mxu2  ;;  %794 = vmatpush.bf16.msrb.mxu3 %v760_v2  ;;  %v763_v12 = vsel %vm136_vm0, %v754_v58, 0 }
 0x310   :  { %v755_v52 = vpack.c.bf16 %v2576_v1, %v2576_v1  ;;  %813 = vmatpush.bf16.msrb.mxu0 %v763_v12  ;;  %v724_v54 = vpop.f32.mrf.mxu3 }
 0x312   :  { %1909 = vmatmul.msk.bf16.vlgmr.msrb.gmra.mxu3 %vm129_vm1, %v2463_v29  ;;  %v766_v7 = vsel %vm136_vm0, %v755_v52, 0 }
 0x313   :  { %1911 = vmatmul.msk.bf16.vlgmr.msrb.gmra.mxu0 %vm129_vm1, %v2463_v29  ;;  %832 = vmatpush.bf16.msra.mxu1 %v766_v7  ;;  %v737_v59 = vpop.f32.mrf.mxu1 }
 0x316   :  { %1908 = vmatmul.msk.bf16.gmra.mxu2 %vm129_vm1, %v2473_v30  ;;  %1913 = vmatmul.msk.bf16.vlgmr.msra.gmra.mxu1 %vm129_vm1, %v2463_v29 }
 0x322   :  { %1910 = vmatmul.msk.bf16.gmra.mxu3 %vm129_vm1, %v2473_v30 }
 0x323   :  { %1912 = vmatmul.msk.bf16.gmra.mxu0 %vm129_vm1, %v2473_v30 }
 0x326   :  { %1914 = vmatmul.msk.bf16.gmra.mxu1 %vm129_vm1, %v2473_v30 }
 0x389   :  { %v777_v24 = vpop.f32.mrf.mxu2 }
 0x38a   :  { %v778_v53 = vadd.f32 %v777_v24, %v2483_v31 }
 0x38c   :  { %v860_v11 = vadd.f32 %v846_v39, %v778_v53 }
 0x38e   :  { %v876_v59 = vmax.f32 %v860_v11, 0.0 }
 0x390   :  { %v815_v28 = vpop.f32.mrf.mxu0 }
 0x391   :  { %v779_v16 = vpop.f32.mrf.mxu2  ;;  %v816_v13 = vadd.f32 %v815_v28, %v2489_v35 }
 0x392   :  { %v780_v57 = vadd.f32 %v779_v16, %v2491_v36 }
 0x393   :  { %v834_v22 = vpop.f32.mrf.mxu1 }
 0x394   :  { %v864_v3 = vadd.f32 %v850_v60, %v780_v57  ;;  %v835_v24 = vadd.f32 %v834_v22, %v2485_v33 }
 0x395   :  { %v796_v20 = vpop.f32.mrf.mxu3 }
 0x396   :  { %v880_v2 = vmax.f32 %v864_v3, 0.0  ;;  %v797_v53 = vadd.f32 %v796_v20, %v2487_v34 }
 0x398   :  { %v817_v18 = vpop.f32.mrf.mxu0  ;;  %v892_v28 = vpack.c.bf16 %v880_v2, %v876_v59  ;;  %v2624_v59 = vld [vmem:[%s3163_s3] sm:$0xff] }
 0x399   :  { %v782_v63 = vpop.f32.mrf.mxu2  ;;  %v818_v9 = vadd.f32 %v817_v18, %v2497_v40 }
 0x39a   :  { %v783_v55 = vadd.f32 %v782_v63, %v2499_v41 }
 0x39b   :  { %v836_v14 = vpop.f32.mrf.mxu1  ;;  %v866_v16 = vadd.f32 %v850_v60, %v818_v9 }
 0x39c   :  { %v868_v62 = vadd.f32 %v854_v10, %v783_v55  ;;  %v837_v54 = vadd.f32 %v836_v14, %v2493_v37 }
 0x39d   :  { %v798_v50 = vpop.f32.mrf.mxu3 }
 0x39e   :  { %v884_v51 = vmax.f32 %v868_v62, 0.0  ;;  %v799_v55 = vadd.f32 %v798_v50, %v2495_v38 }
 0x3a0   :  { %v820_v23 = vpop.f32.mrf.mxu0  ;;  %v865_v50 = vadd.f32 %v850_v60, %v799_v55 }
 0x3a1   :  { %v784_v32 = vpop.f32.mrf.mxu2  ;;  %v821_v21 = vadd.f32 %v820_v23, %v2505_v45 }
 0x3a2   :  { %v785_v44 = vadd.f32 %v784_v32, %v2507_v46  ;;  %v862_v32 = vadd.f32 %v846_v39, %v816_v13 }
 0x3a3   :  { %v839_v17 = vpop.f32.mrf.mxu1  ;;  %v870_v12 = vadd.f32 %v854_v10, %v821_v21  ;;  %v863_v21 = vadd.f32 %v846_v39, %v835_v24  ;;  %v2630_v24 = vld [vmem:[%s3163_s3 + $0x18] sm:$0xff] }
 0x3a4   :  { %v872_v25 = vadd.f32 %v858_v27, %v785_v44  ;;  %v840_v19 = vadd.f32 %v839_v17, %v2501_v42  ;;  %v867_v17 = vadd.f32 %v850_v60, %v837_v54 }
 0x3a5   :  { %v801_v8 = vpop.f32.mrf.mxu3  ;;  %v886_v62 = vmax.f32 %v870_v12, 0.0  ;;  %v879_v12 = vmax.f32 %v863_v21, 0.0 }
 0x3a6   :  { %v888_v0 = vmax.f32 %v872_v25, 0.0  ;;  %v802_v7 = vadd.f32 %v801_v8, %v2503_v43  ;;  %v871_v57 = vadd.f32 %v854_v10, %v840_v19  ;;  %v882_v8 = vmax.f32 %v866_v16, 0.0  ;;  %v2636_v16 = vld [vmem:[%s3163_s3 + $0x10] sm:$0xff] }
 0x3a7   :  { %v861_v19 = vadd.f32 %v846_v39, %v797_v53  ;;  %v883_v20 = vmax.f32 %v867_v17, 0.0  ;;  %v2076_v39 = vmov 11  }
 0x3a8   :  { %v896_v26 = vpack.c.bf16 %v888_v0, %v884_v51  ;;  %v822_v58 = vpop.f32.mrf.mxu0  ;;  %v869_v3 = vadd.f32 %v854_v10, %v802_v7  ;;  %v887_v51 = vmax.f32 %v871_v57, 0.0  ;;  %1991 = vset.pattern.permute.xlu1 %v2076_v39  ;;  %1990 = vset.pattern.permute.xlu0 %v2076_v39 }
 0x3a9   :  { %v823_v52 = vadd.f32 %v822_v58, %v2513_v49  ;;  %v877_v60 = vmax.f32 %v861_v19, 0.0  ;;  %v895_v7 = vpack.c.bf16 %v883_v20, %v879_v12  ;;  %1053 = vperm.xlu1 %1991, %v2624_v59   ;;  %1989 = vset.pattern.permute.xlu2 %v2076_v39 }
 0x3aa   :  { %906 = vmatpush.bf16.msra.mxu2 %v896_v26  ;;  %v878_v26 = vmax.f32 %v862_v32, 0.0  ;;  %v885_v58 = vmax.f32 %v869_v3, 0.0  ;;  %1065 = vperm.xlu0 %1990, %v2630_v24  }
 0x3ab   :  { %v874_v18 = vadd.f32 %v858_v27, %v823_v52  ;;  %v841_v63 = vpop.f32.mrf.mxu1  ;;  %v881_v52 = vmax.f32 %v865_v50, 0.0  ;;  %1061 = vperm.xlu2 %1989, %v2636_v16  }
 0x3ac   :  { %v842_v23 = vadd.f32 %v841_v63, %v2509_v47  ;;  %v894_v13 = vpack.c.bf16 %v882_v8, %v878_v26 }
 0x3ad   :  { %v890_v14 = vmax.f32 %v874_v18, 0.0  ;;  %v803_v44 = vpop.f32.mrf.mxu3  ;;  %v2642_v18 = vld [vmem:[%s3163_s3 + $0x8] sm:$0xff] }
 0x3ae   :  { %v875_v25 = vadd.f32 %v858_v27, %v842_v23  ;;  %v804_v22 = vadd.f32 %v803_v44, %v2511_v48  ;;  %907 = vmatpush.bf16.msra.mxu2 %v892_v28 }
 0x3af   :  { %v898_v11 = vpack.c.bf16 %v890_v14, %v886_v62 }
 0x3b0   :  { %v891_v0 = vmax.f32 %v875_v25, 0.0  ;;  %v873_v9 = vadd.f32 %v858_v27, %v804_v22  ;;  %v893_v27 = vpack.c.bf16 %v881_v52, %v877_v60 }
 0x3b1   :  { %932 = vmatpush.bf16.msra.mxu0 %v898_v11  ;;  %1915 = vmatmul.msk.bf16.vlgmr.msra.gmra.mxu2 %vm369_vm2, %v2537_v5 }
 0x3b2   :  { %v899_v10 = vpack.c.bf16 %v891_v0, %v887_v51  ;;  %v889_v2 = vmax.f32 %v873_v9, 0.0 }
 0x3b3   :  { %1057 = vperm.xlu2 %1989, %v2642_v18  }
 0x3b4   :  { %v897_v54 = vpack.c.bf16 %v889_v2, %v885_v58  ;;  %945 = vmatpush.bf16.msrb.mxu1 %v899_v10 }
 0x3b5   :  { %933 = vmatpush.bf16.msra.mxu0 %v894_v13 }
 0x3b6   :  { %919 = vmatpush.bf16.msra.mxu3 %v897_v54 }
 0x3b8   :  { %1917 = vmatmul.msk.bf16.vlgmr.msra.gmra.mxu0 %vm369_vm2, %v2537_v5  ;;  %946 = vmatpush.bf16.msrb.mxu1 %v895_v7 }
 0x3ba   :  { %920 = vmatpush.bf16.msra.mxu3 %v893_v27 }
 0x3bb   :  { %1918 = vmatmul.msk.bf16.vlgmr.msrb.gmra.mxu1 %vm369_vm2, %v2537_v5 }
 0x3bd   :  { %1916 = vmatmul.msk.bf16.vlgmr.msra.gmra.mxu3 %vm369_vm2, %v2537_v5 }
 0x405   :  { %v2689_v10 = vpop.permute.xlu2 %1061 }
 0x40d   :  { %v1058_v27 = vpop.permute.xlu2 %1057 }
 0x434   :  { %v909_v63 = vpop.f32.mrf.mxu2 }
 0x435   :  { %v952_v55 = vadd.f32 %v909_v63, %v2554_v4  ;;  %v935_v57 = vpop.f32.mrf.mxu0 }
 0x436   :  { %v954_v23 = vadd.f32 %v935_v57, %v2568_v6 }
 0x437   :  { %v2648_v28 = vadd.f32 %v952_v55, %v2550_v61  ;;  %v1066_v55 = vpop.permute.xlu0 %1065 }
 0x438   :  { %v2651_v32 = vadd.f32 %v954_v23, %v2550_v61  ;;  %v948_v53 = vpop.f32.mrf.mxu1 }
 0x439   :  { %v955_v62 = vadd.f32 %v948_v53, %v2576_v1  ;;  %v960_v14 = vpack.c.bf16 %v2648_v28, %v2648_v28 }
 0x43a   :  { %v962_v44 = vpack.c.bf16 %v2651_v32, %v2651_v32 }
 0x43b   :  { %v2659_v4 = vadd.f32 %v955_v62, %v2550_v61  ;;  %v965_v6 = vsel %vm136_vm0, %v960_v14, 0  ;;  %v1054_v14 = vpop.permute.xlu1 %1053 }
 0x43c   :  { %983 = vmatpush.bf16.msrb.mxu2 %v965_v6  ;;  %v971_v17 = vsel %vm136_vm0, %v962_v44, 0  ;;  %v911_v3 = vpop.f32.mrf.mxu2 }
 0x43d   :  { %1021 = vmatpush.bf16.msrb.mxu0 %v971_v17  ;;  %v963_v25 = vpack.c.bf16 %v2659_v4, %v2659_v4  ;;  %v937_v1 = vpop.f32.mrf.mxu0 }
 0x43f   :  { %1919 = vmatmul.msk.bf16.vlgmr.msrb.gmra.mxu2 %vm129_vm1, %v2463_v29  ;;  %v974_v22 = vsel %vm136_vm0, %v963_v25, 0 }
 0x440   :  { %1923 = vmatmul.msk.bf16.vlgmr.msrb.gmra.mxu0 %vm129_vm1, %v2463_v29  ;;  %v922_v21 = vpop.f32.mrf.mxu3  ;;  %1040 = vmatpush.bf16.msra.mxu1 %v974_v22  ;;  %v950_v8 = vpop.f32.mrf.mxu1 }
 0x441   :  { %v953_v11 = vadd.f32 %v922_v21, %v2565_v56 }
 0x443   :  { %v2672_v50 = vadd.f32 %v953_v11, %v2550_v61  ;;  %1925 = vmatmul.msk.bf16.vlgmr.msra.gmra.mxu1 %vm129_vm1, %v2463_v29 }
 0x445   :  { %v961_v51 = vpack.c.bf16 %v2672_v50, %v2672_v50 }
 0x447   :  { %v968_v0 = vsel %vm136_vm0, %v961_v51, 0 }
 0x448   :  { %v924_v9 = vpop.f32.mrf.mxu3  ;;  %1002 = vmatpush.bf16.msrb.mxu3 %v968_v0 }
 0x44b   :  { %1921 = vmatmul.msk.bf16.vlgmr.msrb.gmra.mxu3 %vm129_vm1, %v2463_v29 }
 0x44f   :  { %1920 = vmatmul.msk.bf16.gmra.mxu2 %vm129_vm1, %v2473_v30 }
 0x450   :  { %1924 = vmatmul.msk.bf16.gmra.mxu0 %vm129_vm1, %v2473_v30 }
 0x453   :  { %1926 = vmatmul.msk.bf16.gmra.mxu1 %vm129_vm1, %v2473_v30 }
 0x45b   :  { %1922 = vmatmul.msk.bf16.gmra.mxu3 %vm129_vm1, %v2473_v30 }
 0x4bd   :  { %v1023_v56 = vpop.f32.mrf.mxu0 }
 0x4be   :  { %v1024_v57 = vadd.f32 %v1023_v56, %v2489_v35 }
 0x4c0   :  { %v1042_v26 = vpop.f32.mrf.mxu1  ;;  %v1070_v11 = vadd.f32 %v1054_v14, %v1024_v57 }
 0x4c1   :  { %v1043_v17 = vadd.f32 %v1042_v26, %v2485_v33 }
 0x4c2   :  { %v985_v19 = vpop.f32.mrf.mxu2 }
 0x4c3   :  { %v986_v51 = vadd.f32 %v985_v19, %v2483_v31  ;;  %v1086_v19 = vmax.f32 %v1070_v11, 0.0 }
 0x4c5   :  { %v1025_v20 = vpop.f32.mrf.mxu0 }
 0x4c6   :  { %v1026_v7 = vadd.f32 %v1025_v20, %v2497_v40 }
 0x4c8   :  { %v1044_v58 = vpop.f32.mrf.mxu1  ;;  %v1074_v3 = vadd.f32 %v1058_v27, %v1026_v7 }
 0x4c9   :  { %v1045_v44 = vadd.f32 %v1044_v58, %v2493_v37 }
 0x4ca   :  { %v987_v2 = vpop.f32.mrf.mxu2 }
 0x4cb   :  { %v988_v22 = vadd.f32 %v987_v2, %v2491_v36  ;;  %v1075_v20 = vadd.f32 %v1058_v27, %v1045_v44 }
 0x4cd   :  { %v1028_v13 = vpop.f32.mrf.mxu0  ;;  %v1072_v2 = vadd.f32 %v1058_v27, %v988_v22 }
 0x4ce   :  { %v1004_v12 = vpop.f32.mrf.mxu3  ;;  %v1029_v54 = vadd.f32 %v1028_v13, %v2505_v45 }
 0x4d0   :  { %v1047_v52 = vpop.f32.mrf.mxu1  ;;  %v1078_v23 = vadd.f32 %v2689_v10, %v1029_v54 }
 0x4d1   :  { %v1048_v39 = vadd.f32 %v1047_v52, %v2501_v42  ;;  %v1071_v52 = vadd.f32 %v1054_v14, %v1043_v17 }
 0x4d2   :  { %v990_v60 = vpop.f32.mrf.mxu2  ;;  %v1094_v0 = vmax.f32 %v1078_v23, 0.0  ;;  %v1091_v23 = vmax.f32 %v1075_v20, 0.0 }
 0x4d3   :  { %v991_v6 = vadd.f32 %v990_v60, %v2499_v41  ;;  %v1079_v21 = vadd.f32 %v2689_v10, %v1048_v39  ;;  %v1090_v60 = vmax.f32 %v1074_v3, 0.0 }
 0x4d5   :  { %v1030_v63 = vpop.f32.mrf.mxu0  ;;  %v1076_v58 = vadd.f32 %v2689_v10, %v991_v6  ;;  %v1095_v7 = vmax.f32 %v1079_v21, 0.0  ;;  %v1102_v15 = vpack.c.bf16 %v1090_v60, %v1086_v19  ;;  %v1087_v6 = vmax.f32 %v1071_v52, 0.0 }
 0x4d6   :  { %v1031_v53 = vadd.f32 %v1030_v63, %v2513_v49  ;;  %v1006_v62 = vpop.f32.mrf.mxu3 }
 0x4d7   :  { %v1103_v22 = vpack.c.bf16 %v1091_v23, %v1087_v6  ;;  %v1007_v21 = vadd.f32 %v1006_v62, %v2495_v38 }
 0x4d8   :  { %v1082_v25 = vadd.f32 %v1066_v55, %v1031_v53  ;;  %v1049_v1 = vpop.f32.mrf.mxu1  ;;  %v1068_v53 = vadd.f32 %v1054_v14, %v986_v51 }
 0x4d9   :  { %v1050_v8 = vadd.f32 %v1049_v1, %v2509_v47 }
 0x4da   :  { %v1098_v9 = vmax.f32 %v1082_v25, 0.0  ;;  %v992_v56 = vpop.f32.mrf.mxu2  ;;  %v1092_v25 = vmax.f32 %v1076_v58, 0.0  ;;  %v1084_v17 = vmax.f32 %v1068_v53, 0.0 }
 0x4db   :  { %v1083_v13 = vadd.f32 %v1066_v55, %v1050_v8  ;;  %v993_v26 = vadd.f32 %v992_v56, %v2507_v46  ;;  %v1088_v8 = vmax.f32 %v1072_v2, 0.0 }
 0x4dc   :  { %v1106_v54 = vpack.c.bf16 %v1098_v9, %v1094_v0  ;;  %v1005_v0 = vadd.f32 %v1004_v12, %v2487_v34 }
 0x4dd   :  { %v1099_v39 = vmax.f32 %v1083_v13, 0.0  ;;  %v1080_v63 = vadd.f32 %v1066_v55, %v993_v26  ;;  %v1100_v11 = vpack.c.bf16 %v1088_v8, %v1084_v17 }
 0x4de   :  { %1140 = vmatpush.bf16.msra.mxu0 %v1106_v54  ;;  %v1009_v57 = vpop.f32.mrf.mxu3  ;;  %v1069_v62 = vadd.f32 %v1054_v14, %v1005_v0 }
 0x4df   :  { %v1107_v1 = vpack.c.bf16 %v1099_v39, %v1095_v7  ;;  %v1096_v44 = vmax.f32 %v1080_v63, 0.0  ;;  %v1010_v3 = vadd.f32 %v1009_v57, %v2503_v43 }
 0x4e0   :  { %v1085_v52 = vmax.f32 %v1069_v62, 0.0 }
 0x4e1   :  { %v1104_v31 = vpack.c.bf16 %v1096_v44, %v1092_v25  ;;  %1153 = vmatpush.bf16.msrb.mxu1 %v1107_v1  ;;  %v1077_v9 = vadd.f32 %v2689_v10, %v1010_v3  ;;  %v2077_v10 = vmov 12  }
 0x4e2   :  { %1141 = vmatpush.bf16.msra.mxu0 %v1102_v15  ;;  %v1073_v15 = vadd.f32 %v1058_v27, %v1007_v21  ;;  %1992 = vset.pattern.permute.xlu1 %v2077_v10 }
 0x4e3   :  { %1114 = vmatpush.bf16.msra.mxu2 %v1104_v31  ;;  %v1093_v20 = vmax.f32 %v1077_v9, 0.0  ;;  %1994 = vset.pattern.permute.xlu0 %v2077_v10 }
 0x4e4   :  { %v1089_v13 = vmax.f32 %v1073_v15, 0.0  ;;  %1269 = vperm.xlu1 %1992, %v2636_v16   ;;  %1261 = vperm.xlu0 %1994, %v2624_v59  }
 0x4e5   :  { %1929 = vmatmul.msk.bf16.vlgmr.msra.gmra.mxu0 %vm369_vm2, %v2537_v5  ;;  %1154 = vmatpush.bf16.msrb.mxu1 %v1103_v22 }
 0x4e6   :  { %v1011_v51 = vpop.f32.mrf.mxu3  ;;  %v1101_v12 = vpack.c.bf16 %v1089_v13, %v1085_v52  ;;  %1993 = vset.pattern.permute.xlu2 %v2077_v10 }
 0x4e7   :  { %v1012_v56 = vadd.f32 %v1011_v51, %v2511_v48  ;;  %1115 = vmatpush.bf16.msra.mxu2 %v1100_v11  ;;  %1273 = vperm.xlu2 %1993, %v2630_v24  }
 0x4e8   :  { %1930 = vmatmul.msk.bf16.vlgmr.msrb.gmra.mxu1 %vm369_vm2, %v2537_v5 }
 0x4e9   :  { %v1081_v31 = vadd.f32 %v1066_v55, %v1012_v56 }
 0x4ea   :  { %1927 = vmatmul.msk.bf16.vlgmr.msra.gmra.mxu2 %vm369_vm2, %v2537_v5 }
 0x4eb   :  { %v1097_v58 = vmax.f32 %v1081_v31, 0.0 }
 0x4ec   :  { %1265 = vperm.xlu1 %1992, %v2642_v18  }
 0x4ed   :  { %v1105_v26 = vpack.c.bf16 %v1097_v58, %v1093_v20 }
 0x4ef   :  { %1127 = vmatpush.bf16.msra.mxu3 %v1105_v26 }
 0x4f3   :  { %1128 = vmatpush.bf16.msra.mxu3 %v1101_v12 }
 0x4f6   :  { %1928 = vmatmul.msk.bf16.vlgmr.msra.gmra.mxu3 %vm369_vm2, %v2537_v5 }
 0x541   :  { %v2774_v26 = vpop.permute.xlu2 %1273 }
 0x556   :  { %v2767_v0 = vpop.permute.xlu1 %1269 }
 0x55e   :  { %v2771_v20 = vpop.permute.xlu1 %1265 }
 0x562   :  { %v1143_v27 = vpop.f32.mrf.mxu0 }
 0x563   :  { %v1162_v55 = vadd.f32 %v1143_v27, %v2651_v32 }
 0x565   :  { %v2725_v14 = vadd.f32 %v1162_v55, %v2550_v61  ;;  %v1156_v54 = vpop.f32.mrf.mxu1  ;;  %v1262_v55 = vpop.permute.xlu0 %1261 }
 0x566   :  { %v1163_v60 = vadd.f32 %v1156_v54, %v2659_v4 }
 0x567   :  { %v1170_v2 = vpack.c.bf16 %v2725_v14, %v2725_v14 }
 0x568   :  { %v2731_v7 = vadd.f32 %v1163_v60, %v2550_v61 }
 0x569   :  { %v1179_v39 = vsel %vm136_vm0, %v1170_v2, 0 }
 0x56a   :  { %v1171_v63 = vpack.c.bf16 %v2731_v7, %v2731_v7  ;;  %1229 = vmatpush.bf16.msrb.mxu0 %v1179_v39  ;;  %v1145_v53 = vpop.f32.mrf.mxu0 }
 0x56c   :  { %v1182_v32 = vsel %vm136_vm0, %v1171_v63, 0 }
 0x56d   :  { %1935 = vmatmul.msk.bf16.vlgmr.msrb.gmra.mxu0 %vm129_vm1, %v2463_v29  ;;  %v1117_v57 = vpop.f32.mrf.mxu2  ;;  %1248 = vmatpush.bf16.msra.mxu1 %v1182_v32  ;;  %v1158_v4 = vpop.f32.mrf.mxu1 }
 0x56e   :  { %v1160_v19 = vadd.f32 %v1117_v57, %v2648_v28 }
 0x570   :  { %v2741_v23 = vadd.f32 %v1160_v19, %v2550_v61  ;;  %1937 = vmatmul.msk.bf16.vlgmr.msra.gmra.mxu1 %vm129_vm1, %v2463_v29 }
 0x572   :  { %v1168_v25 = vpack.c.bf16 %v2741_v23, %v2741_v23 }
 0x574   :  { %v1173_v1 = vsel %vm136_vm0, %v1168_v25, 0 }
 0x575   :  { %1191 = vmatpush.bf16.msrb.mxu2 %v1173_v1  ;;  %v1119_v44 = vpop.f32.mrf.mxu2 }
 0x578   :  { %1931 = vmatmul.msk.bf16.vlgmr.msrb.gmra.mxu2 %vm129_vm1, %v2463_v29 }
 0x579   :  { %v1130_v6 = vpop.f32.mrf.mxu3 }
 0x57a   :  { %v1161_v8 = vadd.f32 %v1130_v6, %v2672_v50 }
 0x57c   :  { %v2752_v28 = vadd.f32 %v1161_v8, %v2550_v61 }
 0x57d   :  { %1936 = vmatmul.msk.bf16.gmra.mxu0 %vm129_vm1, %v2473_v30 }
 0x57e   :  { %v1169_v17 = vpack.c.bf16 %v2752_v28, %v2752_v28 }
 0x580   :  { %1938 = vmatmul.msk.bf16.gmra.mxu1 %vm129_vm1, %v2473_v30  ;;  %v1176_v3 = vsel %vm136_vm0, %v1169_v17, 0 }
 0x581   :  { %v1132_v22 = vpop.f32.mrf.mxu3  ;;  %1210 = vmatpush.bf16.msrb.mxu3 %v1176_v3 }
 0x584   :  { %1933 = vmatmul.msk.bf16.vlgmr.msrb.gmra.mxu3 %vm129_vm1, %v2463_v29 }
 0x588   :  { %1932 = vmatmul.msk.bf16.gmra.mxu2 %vm129_vm1, %v2473_v30 }
 0x594   :  { %1934 = vmatmul.msk.bf16.gmra.mxu3 %vm129_vm1, %v2473_v30 }
 0x5ea   :  { %v1231_v50 = vpop.f32.mrf.mxu0 }
 0x5eb   :  { %v1232_v52 = vadd.f32 %v1231_v50, %v2489_v35 }
 0x5ed   :  { %v1250_v21 = vpop.f32.mrf.mxu1  ;;  %v1278_v57 = vadd.f32 %v1262_v55, %v1232_v52 }
 0x5ee   :  { %v1251_v63 = vadd.f32 %v1250_v21, %v2485_v33 }
 0x5ef   :  { %v1294_v21 = vmax.f32 %v1278_v57, 0.0 }
 0x5f0   :  { %v1279_v17 = vadd.f32 %v1262_v55, %v1251_v63 }
 0x5f2   :  { %v1233_v11 = vpop.f32.mrf.mxu0 }
 0x5f3   :  { %v1234_v62 = vadd.f32 %v1233_v11, %v2497_v40 }
 0x5f5   :  { %v1252_v51 = vpop.f32.mrf.mxu1  ;;  %v1282_v60 = vadd.f32 %v2771_v20, %v1234_v62 }
 0x5f6   :  { %v1253_v54 = vadd.f32 %v1252_v51, %v2493_v37 }
 0x5f7   :  { %v1298_v8 = vmax.f32 %v1282_v60, 0.0 }
 0x5f8   :  { %v1283_v1 = vadd.f32 %v2771_v20, %v1253_v54 }
 0x5fa   :  { %v1236_v9 = vpop.f32.mrf.mxu0  ;;  %v1299_v11 = vmax.f32 %v1283_v1, 0.0 }
 0x5fb   :  { %v1193_v56 = vpop.f32.mrf.mxu2  ;;  %v1237_v31 = vadd.f32 %v1236_v9, %v2505_v45  ;;  %v1310_v9 = vpack.c.bf16 %v1298_v8, %v1294_v21 }
 0x5fd   :  { %v1255_v15 = vpop.f32.mrf.mxu1  ;;  %v1286_v12 = vadd.f32 %v2767_v0, %v1237_v31 }
 0x5fe   :  { %v1256_v58 = vadd.f32 %v1255_v15, %v2501_v42  ;;  %v1295_v15 = vmax.f32 %v1279_v17, 0.0 }
 0x5ff   :  { %v1302_v4 = vmax.f32 %v1286_v12, 0.0  ;;  %v3188_v12 = vld [vmem:[#allocation8_spill] sm:$0xff] }
 0x600   :  { %v1287_v53 = vadd.f32 %v2767_v0, %v1256_v58  ;;  %v1311_v58 = vpack.c.bf16 %v1299_v11, %v1295_v15 }
 0x602   :  { %v1238_v13 = vpop.f32.mrf.mxu0  ;;  %v1303_v3 = vmax.f32 %v1287_v53, 0.0 }
 0x603   :  { %v1239_v10 = vadd.f32 %v1238_v13, %v2513_v49  ;;  %v1195_v27 = vpop.f32.mrf.mxu2 }
 0x604   :  { %v1196_v13 = vadd.f32 %v1195_v27, %v2491_v36 }
 0x605   :  { %v1290_v2 = vadd.f32 %v2774_v26, %v1239_v10  ;;  %v1257_v39 = vpop.f32.mrf.mxu1  ;;  %v1194_v10 = vadd.f32 %v1193_v56, %v3188_v12 }
 0x606   :  { %v1258_v32 = vadd.f32 %v1257_v39, %v2509_v47 }
 0x607   :  { %v1306_v19 = vmax.f32 %v1290_v2, 0.0  ;;  %v1212_v25 = vpop.f32.mrf.mxu3  ;;  %v1280_v2 = vadd.f32 %v2771_v20, %v1196_v13  ;;  %v1276_v27 = vadd.f32 %v1262_v55, %v1194_v10 }
 0x608   :  { %v1291_v44 = vadd.f32 %v2774_v26, %v1258_v32  ;;  %v1213_v8 = vadd.f32 %v1212_v25, %v2487_v34 }
 0x609   :  { %v1314_v6 = vpack.c.bf16 %v1306_v19, %v1302_v4  ;;  %v1296_v57 = vmax.f32 %v1280_v2, 0.0  ;;  %v1292_v19 = vmax.f32 %v1276_v27, 0.0 }
 0x60a   :  { %v1307_v22 = vmax.f32 %v1291_v44, 0.0  ;;  %v1277_v21 = vadd.f32 %v1262_v55, %v1213_v8 }
 0x60b   :  { %1348 = vmatpush.bf16.msra.mxu0 %v1314_v6  ;;  %v1198_v50 = vpop.f32.mrf.mxu2  ;;  %v1308_v44 = vpack.c.bf16 %v1296_v57, %v1292_v19 }
 0x60c   :  { %v1315_v51 = vpack.c.bf16 %v1307_v22, %v1303_v3  ;;  %v1199_v62 = vadd.f32 %v1198_v50, %v2499_v41 }
 0x60e   :  { %1361 = vmatpush.bf16.msrb.mxu1 %v1315_v51  ;;  %v1284_v54 = vadd.f32 %v2767_v0, %v1199_v62 }
 0x60f   :  { %1349 = vmatpush.bf16.msra.mxu0 %v1310_v9  ;;  %v1214_v31 = vpop.f32.mrf.mxu3 }
 0x610   :  { %v1300_v53 = vmax.f32 %v1284_v54, 0.0  ;;  %v1215_v1 = vadd.f32 %v1214_v31, %v2495_v38  ;;  %v1293_v31 = vmax.f32 %v1277_v21, 0.0 }
 0x612   :  { %1941 = vmatmul.msk.bf16.vlgmr.msra.gmra.mxu0 %vm369_vm2, %v2537_v5  ;;  %1362 = vmatpush.bf16.msrb.mxu1 %v1311_v58  ;;  %v1281_v22 = vadd.f32 %v2771_v20, %v1215_v1 }
 0x613   :  { %v1200_v52 = vpop.f32.mrf.mxu2 }
 0x614   :  { %v1201_v60 = vadd.f32 %v1200_v52, %v2507_v46  ;;  %v1297_v9 = vmax.f32 %v1281_v22, 0.0 }
 0x615   :  { %1942 = vmatmul.msk.bf16.vlgmr.msrb.gmra.mxu1 %vm369_vm2, %v2537_v5 }
 0x616   :  { %v1288_v39 = vadd.f32 %v2774_v26, %v1201_v60  ;;  %v1309_v25 = vpack.c.bf16 %v1297_v9, %v1293_v31 }
 0x617   :  { %v1217_v63 = vpop.f32.mrf.mxu3 }
 0x618   :  { %v1304_v32 = vmax.f32 %v1288_v39, 0.0  ;;  %v1218_v56 = vadd.f32 %v1217_v63, %v2503_v43 }
 0x61a   :  { %v1312_v4 = vpack.c.bf16 %v1304_v32, %v1300_v53  ;;  %v1285_v17 = vadd.f32 %v2767_v0, %v1218_v56  ;;  %v2078_v0 = vmov 13  }
 0x61b   :  { %1997 = vset.pattern.permute.xlu0 %v2078_v0  ;;  %1995 = vset.pattern.permute.xlu2 %v2078_v0 }
 0x61c   :  { %1322 = vmatpush.bf16.msra.mxu2 %v1312_v4  ;;  %v1301_v11 = vmax.f32 %v1285_v17, 0.0  ;;  %1473 = vperm.xlu0 %1997, %v2642_v18  }
 0x61d   :  { %1477 = vperm.xlu2 %1995, %v2636_v16   ;;  %1996 = vset.pattern.permute.xlu1 %v2078_v0 }
 0x61e   :  { %1481 = vperm.xlu1 %1996, %v2630_v24  }
 0x61f   :  { %v1219_v6 = vpop.f32.mrf.mxu3 }
 0x620   :  { %v1220_v3 = vadd.f32 %v1219_v6, %v2511_v48  ;;  %1323 = vmatpush.bf16.msra.mxu2 %v1308_v44 }
 0x622   :  { %v1289_v50 = vadd.f32 %v2774_v26, %v1220_v3 }
 0x623   :  { %1939 = vmatmul.msk.bf16.vlgmr.msra.gmra.mxu2 %vm369_vm2, %v2537_v5 }
 0x624   :  { %v1305_v51 = vmax.f32 %v1289_v50, 0.0 }
 0x625   :  { %1469 = vperm.xlu2 %1995, %v2624_v59  }
 0x626   :  { %v1313_v15 = vpack.c.bf16 %v1305_v51, %v1301_v11 }
 0x628   :  { %1335 = vmatpush.bf16.msra.mxu3 %v1313_v15 }
 0x62c   :  { %1336 = vmatpush.bf16.msra.mxu3 %v1309_v25 }
 0x62f   :  { %1940 = vmatmul.msk.bf16.vlgmr.msra.gmra.mxu3 %vm369_vm2, %v2537_v5 }
 0x677   :  { %v2857_v1 = vpop.permute.xlu2 %1477 }
 0x67f   :  { %v2869_v51 = vpop.permute.xlu2 %1469 }
 0x68e   :  { %v2861_v3 = vpop.permute.xlu0 %1473 }
 0x68f   :  { %v1351_v20 = vpop.f32.mrf.mxu0 }
 0x690   :  { %v1370_v26 = vadd.f32 %v1351_v20, %v2725_v14  ;;  %v2864_v50 = vpop.permute.xlu1 %1481 }
 0x692   :  { %v2814_v55 = vadd.f32 %v1370_v26, %v2550_v61  ;;  %v1364_v62 = vpop.f32.mrf.mxu1 }
 0x693   :  { %v1371_v58 = vadd.f32 %v1364_v62, %v2731_v7 }
 0x694   :  { %v1378_v13 = vpack.c.bf16 %v2814_v55, %v2814_v55 }
 0x695   :  { %v2820_v52 = vadd.f32 %v1371_v58, %v2550_v61 }
 0x696   :  { %v1387_v16 = vsel %vm136_vm0, %v1378_v13, 0 }
 0x697   :  { %v1379_v24 = vpack.c.bf16 %v2820_v52, %v2820_v52  ;;  %1437 = vmatpush.bf16.msrb.mxu0 %v1387_v16  ;;  %v1353_v18 = vpop.f32.mrf.mxu0 }
 0x699   :  { %v1390_v14 = vsel %vm136_vm0, %v1379_v24, 0 }
 0x69a   :  { %1947 = vmatmul.msk.bf16.vlgmr.msrb.gmra.mxu0 %vm129_vm1, %v2463_v29  ;;  %1456 = vmatpush.bf16.msra.mxu1 %v1390_v14  ;;  %v1366_v7 = vpop.f32.mrf.mxu1 }
 0x69d   :  { %1949 = vmatmul.msk.bf16.vlgmr.msra.gmra.mxu1 %vm129_vm1, %v2463_v29 }
 0x6a6   :  { %v1325_v10 = vpop.f32.mrf.mxu2 }
 0x6a7   :  { %v1368_v59 = vadd.f32 %v1325_v10, %v2741_v23 }
 0x6a9   :  { %v2833_v54 = vadd.f32 %v1368_v59, %v2550_v61 }
 0x6aa   :  { %1948 = vmatmul.msk.bf16.gmra.mxu0 %vm129_vm1, %v2473_v30 }
 0x6ab   :  { %v1376_v60 = vpack.c.bf16 %v2833_v54, %v2833_v54 }
 0x6ad   :  { %1950 = vmatmul.msk.bf16.gmra.mxu1 %vm129_vm1, %v2473_v30  ;;  %v1381_v2 = vsel %vm136_vm0, %v1376_v60, 0 }
 0x6ae   :  { %1399 = vmatpush.bf16.msrb.mxu2 %v1381_v2  ;;  %v1327_v39 = vpop.f32.mrf.mxu2 }
 0x6b1   :  { %1943 = vmatmul.msk.bf16.vlgmr.msrb.gmra.mxu2 %vm129_vm1, %v2463_v29 }
 0x6b2   :  { %v1338_v23 = vpop.f32.mrf.mxu3 }
 0x6b3   :  { %v1369_v63 = vadd.f32 %v1338_v23, %v2752_v28 }
 0x6b5   :  { %v2846_v27 = vadd.f32 %v1369_v63, %v2550_v61 }
 0x6b7   :  { %v1377_v53 = vpack.c.bf16 %v2846_v27, %v2846_v27 }
 0x6b9   :  { %v1384_v32 = vsel %vm136_vm0, %v1377_v53, 0 }
 0x6ba   :  { %v1340_v57 = vpop.f32.mrf.mxu3  ;;  %1418 = vmatpush.bf16.msrb.mxu3 %v1384_v32 }
 0x6bd   :  { %1945 = vmatmul.msk.bf16.vlgmr.msrb.gmra.mxu3 %vm129_vm1, %v2463_v29 }
 0x6c1   :  { %1944 = vmatmul.msk.bf16.gmra.mxu2 %vm129_vm1, %v2473_v30 }
 0x6cd   :  { %1946 = vmatmul.msk.bf16.gmra.mxu3 %vm129_vm1, %v2473_v30 }
 0x717   :  { %v1439_v28 = vpop.f32.mrf.mxu0 }
 0x718   :  { %v1440_v30 = vadd.f32 %v1439_v28, %v2489_v35 }
 0x71a   :  { %v1458_v4 = vpop.f32.mrf.mxu1  ;;  %v1486_v35 = vadd.f32 %v2869_v51, %v1440_v30 }
 0x71f   :  { %v1441_v19 = vpop.f32.mrf.mxu0 }
 0x720   :  { %v1442_v17 = vadd.f32 %v1441_v19, %v2497_v40 }
 0x722   :  { %v1460_v56 = vpop.f32.mrf.mxu1 }
 0x723   :  { %v1461_v9 = vadd.f32 %v1460_v56, %v2493_v37 }
 0x725   :  { %v1491_v26 = vadd.f32 %v2861_v3, %v1461_v9 }
 0x727   :  { %v1444_v44 = vpop.f32.mrf.mxu0  ;;  %v1507_v18 = vmax.f32 %v1491_v26, 0.0 }
 0x728   :  { %v1445_v8 = vadd.f32 %v1444_v44, %v2505_v45  ;;  %v1490_v45 = vadd.f32 %v2861_v3, %v1442_v17 }
 0x72a   :  { %v1463_v6 = vpop.f32.mrf.mxu1  ;;  %v1494_v21 = vadd.f32 %v2857_v1, %v1445_v8  ;;  %v1506_v62 = vmax.f32 %v1490_v45, 0.0 }
 0x72b   :  { %v1464_v29 = vadd.f32 %v1463_v6, %v2501_v42  ;;  %v1459_v42 = vadd.f32 %v1458_v4, %v2485_v33  ;;  %v1502_v33 = vmax.f32 %v1486_v35, 0.0 }
 0x72c   :  { %v1510_v0 = vmax.f32 %v1494_v21, 0.0 }
 0x72d   :  { %v1495_v31 = vadd.f32 %v2857_v1, %v1464_v29  ;;  %v1487_v13 = vadd.f32 %v2869_v51, %v1459_v42 }
 0x72f   :  { %v1446_v22 = vpop.f32.mrf.mxu0  ;;  %v1511_v16 = vmax.f32 %v1495_v31, 0.0  ;;  %v1503_v7 = vmax.f32 %v1487_v13, 0.0 }
 0x730   :  { %v1447_v11 = vadd.f32 %v1446_v22, %v2513_v49 }
 0x731   :  { %v1519_v59 = vpack.c.bf16 %v1507_v18, %v1503_v7  ;;  %v2009_v18 = vld [vmem:[%s3164_s1 + $0x168] sm:$0xff] }
 0x732   :  { %v1498_v40 = vadd.f32 %v2864_v50, %v1447_v11  ;;  %v1465_v15 = vpop.f32.mrf.mxu1  ;;  %v2012_v7 = vld [vmem:[%s3164_s1 + $0x1e8] sm:$0xff] }
 0x733   :  { %v1466_v25 = vadd.f32 %v1465_v15, %v2509_v47  ;;  %v1518_v47 = vpack.c.bf16 %v1506_v62, %v1502_v33  ;;  %v2008_v33 = vld [vmem:[%s3164_s1 + $0x1f8] sm:$0xff] }
 0x734   :  { %v1514_v20 = vmax.f32 %v1498_v40, 0.0  ;;  %v1401_v49 = vpop.f32.mrf.mxu2 }
 0x735   :  { %v1499_v37 = vadd.f32 %v2864_v50, %v1466_v25  ;;  %v1402_v32 = vadd.f32 %v1401_v49, %v3188_v12 }
 0x736   :  { %v1522_v58 = vpack.c.bf16 %v1514_v20, %v1510_v0 }
 0x737   :  { %v1515_v24 = vmax.f32 %v1499_v37, 0.0 }
 0x738   :  { %1556 = vmatpush.bf16.msra.mxu0 %v1522_v58 }
 0x739   :  { %v1523_v14 = vpack.c.bf16 %v1515_v24, %v1511_v16  ;;  %v3189_v16 = vld [vmem:[#allocation2_spill] sm:$0xff]  ;;  %v2007_v24 = vld [vmem:[%s3164_s1 + $0x170] sm:$0xff] }
 0x73b   :  { %1569 = vmatpush.bf16.msrb.mxu1 %v1523_v14  ;;  %v2010_v14 = vld [vmem:[%s3164_s1 + $0x1f0] sm:$0xff] }
 0x73c   :  { %1557 = vmatpush.bf16.msra.mxu0 %v1518_v47  ;;  %v1403_v10 = vpop.f32.mrf.mxu2  ;;  %v2011_v47 = vld [vmem:[%s3164_s1 + $0x160] sm:$0xff] }
 0x73d   :  { %v1404_v63 = vadd.f32 %v1403_v10, %v2491_v36  ;;  %v2013_v10 = vld [vmem:[%s3164_s1 + $0x158] sm:$0xff] }
 0x73f   :  { %1953 = vmatmul.msk.bf16.vlgmr.msra.gmra.mxu0 %vm369_vm2, %v2537_v5  ;;  %1570 = vmatpush.bf16.msrb.mxu1 %v1519_v59  ;;  %v1488_v4 = vadd.f32 %v2861_v3, %v1404_v63  ;;  %v2014_v59 = vld [vmem:[%s3164_s1 + $0x1e0] sm:$0xff] }
 0x740   :  { %v1420_v60 = vpop.f32.mrf.mxu3  ;;  %v2019_v63 = vld [vmem:[%s3164_s1 + $0x140] sm:$0xff] }
 0x741   :  { %v1504_v8 = vmax.f32 %v1488_v4, 0.0  ;;  %v2023_v4 = vld [vmem:[%s3164_s1 + $0x130] sm:$0xff] }
 0x742   :  { %1954 = vmatmul.msk.bf16.vlgmr.msrb.gmra.mxu1 %vm369_vm2, %v2537_v5  ;;  %v1484_v5 = vadd.f32 %v2869_v51, %v1402_v32  ;;  %v2021_v32 = vld [vmem:[%s3164_s1 + $0x138] sm:$0xff] }
 0x744   :  { %v1406_v2 = vpop.f32.mrf.mxu2  ;;  %v1500_v17 = vmax.f32 %v1484_v5, 0.0 }
 0x745   :  { %v1407_v23 = vadd.f32 %v1406_v2, %v2499_v41  ;;  %v2016_v2 = vld [vmem:[%s3164_s1 + $0x1d8] sm:$0xff] }
 0x746   :  { %v1516_v29 = vpack.c.bf16 %v1504_v8, %v1500_v17  ;;  %v2027_v8 = vld [vmem:[%s3164_s1 + $0x120] sm:$0xff] }
 0x747   :  { %v1492_v57 = vadd.f32 %v2857_v1, %v1407_v23  ;;  %v2018_v23 = vld [vmem:[%s3164_s1 + $0x1d0] sm:$0xff] }
 0x748   :  { %v1422_v39 = vpop.f32.mrf.mxu3 }
 0x749   :  { %v1508_v44 = vmax.f32 %v1492_v57, 0.0  ;;  %v1423_v12 = vadd.f32 %v1422_v39, %v2495_v38  ;;  %v2017_v39 = vld [vmem:[%s3164_s1 + $0x148] sm:$0xff] }
 0x74a   :  { %v3190_v57 = vld [vmem:[#allocation3_spill] sm:$0xff] }
 0x74b   :  { %v1489_v11 = vadd.f32 %v2861_v3, %v1423_v12 }
 0x74c   :  { %v1408_v53 = vpop.f32.mrf.mxu2 }
 0x74d   :  { %v1409_v28 = vadd.f32 %v1408_v53, %v2507_v46  ;;  %v1421_v46 = vadd.f32 %v1420_v60, %v2487_v34  ;;  %v1505_v34 = vmax.f32 %v1489_v11, 0.0  ;;  %v2015_v60 = vld [vmem:[%s3164_s1 + $0x150] sm:$0xff]  ;;  %v2020_v53 = vld [vmem:[%s3164_s1 + $0x1c8] sm:$0xff] }
 0x74e   :  { %v2034_v11 = vld [vmem:[%s3164_s1 + $0x190] sm:$0xff] }
 0x74f   :  { %v1496_v19 = vadd.f32 %v2864_v50, %v1409_v28  ;;  %v1485_v38 = vadd.f32 %v2869_v51, %v1421_v46  ;;  %v2022_v28 = vld [vmem:[%s3164_s1 + $0x1c0] sm:$0xff] }
 0x750   :  { %v1425_v56 = vpop.f32.mrf.mxu3 }
 0x751   :  { %v1512_v6 = vmax.f32 %v1496_v19, 0.0  ;;  %v1426_v36 = vadd.f32 %v1425_v56, %v2503_v43  ;;  %v2005_v43 = vld [vmem:[%s3165_s2 + $0x10] sm:$0x3]  ;;  %v2024_v19 = vld [vmem:[%s3164_s1 + $0x1b8] sm:$0xff]  ;;  %v2025_v56 = vld [vmem:[%s3164_s1 + $0x128] sm:$0xff] }
 0x753   :  { %v1520_v41 = vpack.c.bf16 %v1512_v6, %v1508_v44  ;;  %v1493_v30 = vadd.f32 %v2857_v1, %v1426_v36  ;;  %v1501_v1 = vmax.f32 %v1485_v38, 0.0  ;;  %v2026_v44 = vld [vmem:[%s3164_s1 + $0x1b0] sm:$0xff]  ;;  %v2029_v36 = vld [vmem:[%s3164_s1 + $0x118] sm:$0xff]  ;;  %v2036_v38 = vld [vmem:[%s3164_s1 + $0x188] sm:$0xff] }
 0x755   :  { %1530 = vmatpush.bf16.msra.mxu2 %v1520_v41  ;;  %v1509_v45 = vmax.f32 %v1493_v30, 0.0  ;;  %v2028_v41 = vld [vmem:[%s3164_s1 + $0x1a8] sm:$0xff] }
 0x756   :  { %v2033_v30 = vld [vmem:[%s3164_s1 + $0x108] sm:$0xff] }
 0x758   :  { %v1427_v22 = vpop.f32.mrf.mxu3 }
 0x759   :  { %v1428_v21 = vadd.f32 %v1427_v22, %v2511_v48  ;;  %1531 = vmatpush.bf16.msra.mxu2 %v1516_v29  ;;  %v1517_v48 = vpack.c.bf16 %v1505_v34, %v1501_v1  ;;  %v2031_v29 = vld [vmem:[%s3164_s1 + $0x110] sm:$0xff]  ;;  %v2032_v22 = vld [vmem:[%s3164_s1 + $0x198] sm:$0xff]  ;;  %v2037_v34 = vld [vmem:[%s3164_s1 + $0x180] sm:$0xff] }
 0x75a   :  { %v2038_v1 = vld [vmem:[%s3164_s1 + $0x78] sm:$0xff] }
 0x75b   :  { %v1497_v9 = vadd.f32 %v2864_v50, %v1428_v21 }
 0x75c   :  { %1951 = vmatmul.msk.bf16.vlgmr.msra.gmra.mxu2 %vm369_vm2, %v2005_v43 }
 0x75d   :  { %v1513_v40 = vmax.f32 %v1497_v9, 0.0 }
 0x75f   :  { %v1521_v15 = vpack.c.bf16 %v1513_v40, %v1509_v45 }
 0x761   :  { %1543 = vmatpush.bf16.msra.mxu3 %v1521_v15 }
 0x765   :  { %1544 = vmatpush.bf16.msra.mxu3 %v1517_v48 }
 0x768   :  { %1952 = vmatmul.msk.bf16.vlgmr.msra.gmra.mxu3 %vm369_vm2, %v2005_v43  ;;  %v2035_v43 = vld [vmem:[%s3164_s1 + $0x100] sm:$0xff] }
 0x7bc   :  { %v1559_v3 = vpop.f32.mrf.mxu0 }
 0x7bd   :  { %v1578_v50 = vadd.f32 %v1559_v3, %v2814_v55  ;;  %v2006_v55 = vld [vmem:[%s3164_s1 + $0x178] sm:$0xff]  ;;  %v2039_v3 = vld [vmem:[%s3164_s1 + $0x70] sm:$0xff] }
 0x7bf   :  { %v1582_v42 = vadd.f32 %v1578_v50, %v2550_v61  ;;  %v1572_v31 = vpop.f32.mrf.mxu1 }
 0x7c0   :  { %v1579_v25 = vadd.f32 %v1572_v31, %v2820_v52 }
 0x7c1   :  { %v1586_v35 = vmax.f32 %v1582_v42, 0.0 }
 0x7c2   :  { %v1583_v51 = vadd.f32 %v1579_v25, %v2550_v61 }
 0x7c3   :  { %v1590_v0 = vmin.f32 %v1586_v35, 1.0  ;;  %v2042_v35 = vld [vmem:[%s3164_s1 + $0x58] sm:$0xff] }
 0x7c4   :  { %v1587_v20 = vmax.f32 %v1583_v51, 0.0  ;;  %v1561_v49 = vpop.f32.mrf.mxu0 }
 0x7c5   :  { %v1594_v26 = vpack.c.bf16 %v1590_v0, %v1590_v0  ;;  %v2043_v0 = vld [vmem:[%s3164_s1 + $0x50] sm:$0xff]  ;;  %v2045_v49 = vld [vmem:[%s3164_s1 + $0x48] sm:$0xff] }
 0x7c6   :  { %v1591_v37 = vmin.f32 %v1587_v20, 1.0  ;;  %v2044_v20 = vld [vmem:[%s3164_s1 + $0xf8] sm:$0xff] }
 0x7c7   :  { %v1603_v62 = vsel %vm136_vm0, %v1594_v26, 0  ;;  %v1574_v58 = vpop.f32.mrf.mxu1  ;;  %v2046_v26 = vld [vmem:[%s3164_s1 + $0x40] sm:$0xff] }
 0x7c8   :  { %v1595_v13 = vpack.c.bf16 %v1591_v37, %v1591_v37  ;;  %1653 = vmatpush.bf16.msrb.mxu0 %v1603_v62  ;;  %v2047_v37 = vld [vmem:[%s3164_s1 + $0xf0] sm:$0xff]  ;;  %v2048_v62 = vld [vmem:[%s3164_s1 + $0x38] sm:$0xff]  ;;  %v2049_v58 = vld [vmem:[%s3164_s1 + $0xe8] sm:$0xff] }
 0x7ca   :  { %v1606_v52 = vsel %vm136_vm0, %v1595_v13, 0  ;;  %v2050_v13 = vld [vmem:[%s3164_s1 + $0x30] sm:$0xff] }
 0x7cb   :  { %1959 = vmatmul.msk.bf16.vlgmr.msrb.gmra.mxu0 %vm129_vm1, %v3189_v16  ;;  %1672 = vmatpush.bf16.msra.mxu1 %v1606_v52  ;;  %v2052_v52 = vld [vmem:[%s3164_s1 + $0x28] sm:$0xff] }
 0x7cc   :  { %1758 = vmatpush.msra.mxu0 %v2006_v55  ;;  %v2051_v55 = vld [vmem:[%s3164_s1 + $0xe0] sm:$0xff] }
 0x7ce   :  { %1759 = vmatpush.msra.mxu0 %v2007_v24  ;;  %1961 = vmatmul.msk.bf16.vlgmr.msra.gmra.mxu1 %vm129_vm1, %v3189_v16  ;;  %v2054_v24 = vld [vmem:[%s3164_s1 + $0x20] sm:$0xff] }
 0x7cf   :  { %1787 = vmatpush.msrb.mxu1 %v2008_v33  ;;  %v2055_v33 = vld [vmem:[%s3164_s1 + $0xd0] sm:$0xff] }
 0x7d0   :  { %1760 = vmatpush.msra.mxu0 %v2009_v18  ;;  %v2056_v18 = vld [vmem:[%s3164_s1 + $0x18] sm:$0xff] }
 0x7d1   :  { %1788 = vmatpush.msrb.mxu1 %v2010_v14  ;;  %v2057_v14 = vld [vmem:[%s3164_s1 + $0xc8] sm:$0xff] }
 0x7d2   :  { %1761 = vmatpush.msra.mxu0 %v2011_v47  ;;  %v2058_v47 = vld [vmem:[%s3164_s1 + $0x10] sm:$0xff] }
 0x7d3   :  { %1789 = vmatpush.msrb.mxu1 %v2012_v7  ;;  %v2059_v7 = vld [vmem:[%s3164_s1 + $0xc0] sm:$0xff] }
 0x7d4   :  { %1762 = vmatpush.msra.mxu0 %v2013_v10  ;;  %v2060_v10 = vld [vmem:[%s3164_s1 + $0x8] sm:$0xff] }
 0x7d5   :  { %1790 = vmatpush.msrb.mxu1 %v2014_v59  ;;  %v2061_v59 = vld [vmem:[%s3164_s1 + $0xb8] sm:$0xff] }
 0x7d6   :  { %1763 = vmatpush.msra.mxu0 %v2015_v60  ;;  %v2062_v60 = vld [vmem:[%s3164_s1] sm:$0xff] }
 0x7d7   :  { %1791 = vmatpush.msrb.mxu1 %v2016_v2  ;;  %v2063_v2 = vld [vmem:[%s3164_s1 + $0xb0] sm:$0xff] }
 0x7d8   :  { %1764 = vmatpush.msra.mxu0 %v2017_v39  ;;  %v2064_v39 = vld [vmem:[%s3164_s1 + $0xa8] sm:$0xff] }
 0x7d9   :  { %1792 = vmatpush.msrb.mxu1 %v2018_v23  ;;  %v2065_v23 = vld [vmem:[%s3164_s1 + $0xa0] sm:$0xff] }
 0x7da   :  { %1765 = vmatpush.msra.mxu0 %v2019_v63  ;;  %v2066_v63 = vld [vmem:[%s3164_s1 + $0x98] sm:$0xff] }
 0x7db   :  { %1793 = vmatpush.msrb.mxu1 %v2020_v53  ;;  %1960 = vmatmul.msk.bf16.gmra.mxu0 %vm129_vm1, %v3190_v57  ;;  %v2067_v53 = vld [vmem:[%s3164_s1 + $0x90] sm:$0xff] }
 0x7dc   :  { %1766 = vmatpush.msra.mxu0 %v2021_v32  ;;  %v2068_v32 = vld [vmem:[%s3164_s1 + $0x88] sm:$0xff] }
 0x7dd   :  { %1794 = vmatpush.msrb.mxu1 %v2022_v28 }
 0x7de   :  { %1767 = vmatpush.msra.mxu0 %v2023_v4  ;;  %1962 = vmatmul.msk.bf16.gmra.mxu1 %vm129_vm1, %v3190_v57  ;;  %v3191_v4 = vld [vmem:[#allocation4_spill] sm:$0xff] }
 0x7df   :  { %1795 = vmatpush.msrb.mxu1 %v2024_v19  ;;  %v1533_v5 = vpop.f32.mrf.mxu2 }
 0x7e0   :  { %1768 = vmatpush.msra.mxu0 %v2025_v56  ;;  %v1576_v6 = vadd.f32 %v1533_v5, %v2833_v54  ;;  %v2030_v54 = vld [vmem:[%s3164_s1 + $0x1a0] sm:$0xff] }
 0x7e1   :  { %1796 = vmatpush.msrb.mxu1 %v2026_v44 }
 0x7e2   :  { %1769 = vmatpush.msra.mxu0 %v2027_v8  ;;  %v1580_v17 = vadd.f32 %v1576_v6, %v2550_v61 }
 0x7e3   :  { %1797 = vmatpush.msrb.mxu1 %v2028_v41  ;;  %v3192_v41 = vld [vmem:[#allocation5_spill] sm:$0xff] }
 0x7e4   :  { %1770 = vmatpush.msra.mxu0 %v2029_v36  ;;  %v1584_v12 = vmax.f32 %v1580_v17, 0.0 }
 0x7e5   :  { %1798 = vmatpush.msrb.mxu1 %v2030_v54 }
 0x7e6   :  { %1771 = vmatpush.msra.mxu0 %v2031_v29  ;;  %v1588_v46 = vmin.f32 %v1584_v12, 1.0 }
 0x7e7   :  { %1799 = vmatpush.msrb.mxu1 %v2032_v22  ;;  %v1535_v21 = vpop.f32.mrf.mxu2 }
 0x7e8   :  { %1772 = vmatpush.msra.mxu0 %v2033_v30  ;;  %v1592_v9 = vpack.c.bf16 %v1588_v46, %v1588_v46  ;;  %v3193_v46 = vld [vmem:[#allocation6_spill] sm:$0xff] }
 0x7e9   :  { %1800 = vmatpush.msrb.mxu1 %v2034_v11 }
 0x7ea   :  { %1773 = vmatpush.msra.mxu0 %v2035_v43  ;;  %v1597_v45 = vsel %vm136_vm0, %v1592_v9, 0 }
 0x7eb   :  { %1801 = vmatpush.msrb.mxu1 %v2036_v38  ;;  %v1546_v40 = vpop.f32.mrf.mxu3  ;;  %1615 = vmatpush.bf16.msrb.mxu2 %v1597_v45  ;;  %v3194_v45 = vld [vmem:[#allocation7_spill] sm:$0xff] }
 0x7ec   :  { %v1577_v15 = vadd.f32 %v1546_v40, %v2846_v27  ;;  %v2040_v27 = vld [vmem:[%s3164_s1 + $0x68] sm:$0xff] }
 0x7ed   :  { %1802 = vmatpush.msrb.mxu1 %v2037_v34 }
 0x7ee   :  { %v1581_v48 = vadd.f32 %v1577_v15, %v2550_v61  ;;  %1955 = vmatmul.msk.bf16.vlgmr.msrb.gmra.mxu2 %vm129_vm1, %v3189_v16  ;;  %v2041_v61 = vld [vmem:[%s3164_s1 + $0x60] sm:$0xff] }
 0x7ef   :  { %1700 = vmatpush.msra.mxu2 %v2038_v1 }
 0x7f0   :  { %v1585_v50 = vmax.f32 %v1581_v48, 0.0 }
 0x7f1   :  { %1701 = vmatpush.msra.mxu2 %v2039_v3 }
 0x7f2   :  { %v1589_v42 = vmin.f32 %v1585_v50, 1.0 }
 0x7f3   :  { %1702 = vmatpush.msra.mxu2 %v2040_v27  ;;  %v1548_v31 = vpop.f32.mrf.mxu3 }
 0x7f4   :  { %v1593_v25 = vpack.c.bf16 %v1589_v42, %v1589_v42 }
 0x7f5   :  { %1703 = vmatpush.msra.mxu2 %v2041_v61 }
 0x7f6   :  { %v1600_v51 = vsel %vm136_vm0, %v1593_v25, 0 }
 0x7f7   :  { %1704 = vmatpush.msra.mxu2 %v2042_v35  ;;  %1634 = vmatpush.bf16.msrb.mxu3 %v1600_v51 }
 0x7f9   :  { %1705 = vmatpush.msra.mxu2 %v2043_v0 }
 0x7fa   :  { %1957 = vmatmul.msk.bf16.vlgmr.msrb.gmra.mxu3 %vm129_vm1, %v3189_v16  ;;  %v2053_v16 = vld [vmem:[%s3164_s1 + $0xd8] sm:$0xff] }
 0x7fb   :  { %1729 = vmatpush.msra.mxu3 %v2044_v20  ;;  %1706 = vmatpush.msra.mxu2 %v2045_v49 }
 0x7fd   :  { %1707 = vmatpush.msra.mxu2 %v2046_v26  ;;  %1730 = vmatpush.msra.mxu3 %v2047_v37 }
 0x7fe   :  { %1956 = vmatmul.msk.bf16.gmra.mxu2 %vm129_vm1, %v3190_v57 }
 0x7ff   :  { %1708 = vmatpush.msra.mxu2 %v2048_v62  ;;  %1731 = vmatpush.msra.mxu3 %v2049_v58 }
 0x801   :  { %1709 = vmatpush.msra.mxu2 %v2050_v13  ;;  %1732 = vmatpush.msra.mxu3 %v2051_v55 }
 0x803   :  { %1710 = vmatpush.msra.mxu2 %v2052_v52  ;;  %1733 = vmatpush.msra.mxu3 %v2053_v16 }
 0x805   :  { %1711 = vmatpush.msra.mxu2 %v2054_v24  ;;  %1734 = vmatpush.msra.mxu3 %v2055_v33 }
 0x807   :  { %1712 = vmatpush.msra.mxu2 %v2056_v18  ;;  %1735 = vmatpush.msra.mxu3 %v2057_v14 }
 0x809   :  { %1713 = vmatpush.msra.mxu2 %v2058_v47  ;;  %1736 = vmatpush.msra.mxu3 %v2059_v7 }
 0x80a   :  { %1958 = vmatmul.msk.bf16.gmra.mxu3 %vm129_vm1, %v3190_v57  ;;  %v2069_v57 = vld [vmem:[%s3164_s1 + $0x80] sm:$0xff] }
 0x80b   :  { %1714 = vmatpush.msra.mxu2 %v2060_v10  ;;  %1737 = vmatpush.msra.mxu3 %v2061_v59 }
 0x80d   :  { %1715 = vmatpush.msra.mxu2 %v2062_v60  ;;  %1738 = vmatpush.msra.mxu3 %v2063_v2 }
 0x80f   :  { %1739 = vmatpush.msra.mxu3 %v2064_v39 }
 0x811   :  { %1740 = vmatpush.msra.mxu3 %v2065_v23 }
 0x813   :  { %1741 = vmatpush.msra.mxu3 %v2066_v63  ;;  %v104_v63 = vld [vmem:[%s3163_s3 + $0x8] sm:$0x3] }
 0x815   :  { %1742 = vmatpush.msra.mxu3 %v2067_v53  ;;  %v2079_v53 = vmov 15  }
 0x816   :  { %1998 = vset.pattern.permute.xlu1 %v2079_v53  ;;  %1999 = vset.pattern.permute.xlu2 %v2079_v53 }
 0x817   :  { %1743 = vmatpush.msra.mxu3 %v2068_v32  ;;  %v2070_v32 = vld [vmem:[%s3163_s3] sm:$0xff]  ;;  %1824 = vperm.xlu2 %1999, %v104_v63  }
 0x818   :  { %1819 = vperm.xlu1 %1998, %v2070_v32   ;;  %2000 = vset.pattern.permute.xlu0 %v2079_v53 }
 0x819   :  { %1744 = vmatpush.msra.mxu3 %v2069_v57 }
 0x848   :  { %v1655_v28 = vpop.f32.mrf.mxu0 }
 0x849   :  { %v1656_v19 = vadd.f32 %v1655_v28, %v3191_v4 }
 0x84b   :  { %v1686_v56 = vmax.f32 %v1656_v19, 0.0  ;;  %v1674_v5 = vpop.f32.mrf.mxu1 }
 0x84c   :  { %v1675_v44 = vadd.f32 %v1674_v5, %v3191_v4 }
 0x84d   :  { %1774 = vmatmul.f32.vlgmr.msra.gmra.mxu0 %v1686_v56 }
 0x84e   :  { %v1687_v6 = vmax.f32 %v1675_v44, 0.0 }
 0x850   :  { %v1657_v8 = vpop.f32.mrf.mxu0  ;;  %1803 = vmatmul.f32.vlgmr.msrb.gmra.mxu1 %v1687_v6 }
 0x851   :  { %v1658_v17 = vadd.f32 %v1657_v8, %v3192_v41 }
 0x853   :  { %v1690_v36 = vmax.f32 %v1658_v17, 0.0  ;;  %v1676_v54 = vpop.f32.mrf.mxu1 }
 0x854   :  { %v1677_v12 = vadd.f32 %v1676_v54, %v3192_v41 }
 0x855   :  { %1777 = vmatmul.f32.gmra.mxu0 %v1690_v36 }
 0x856   :  { %v1691_v29 = vmax.f32 %v1677_v12, 0.0 }
 0x858   :  { %v1660_v22 = vpop.f32.mrf.mxu0  ;;  %1806 = vmatmul.f32.gmra.mxu1 %v1691_v29 }
 0x859   :  { %v1661_v30 = vadd.f32 %v1660_v22, %v3193_v46 }
 0x85b   :  { %v1694_v21 = vmax.f32 %v1661_v30, 0.0  ;;  %v1679_v11 = vpop.f32.mrf.mxu1 }
 0x85c   :  { %v1680_v9 = vadd.f32 %v1679_v11, %v3193_v46  ;;  %v1970_v11 = vld [vmem:[%s3165_s2 + $0x10] sm:$0x70] }
 0x85d   :  { %1780 = vmatmul.f32.gmra.mxu0 %v1694_v21  ;;  %v1965_v21 = vld [vmem:[%s3165_s2 + $0x10] sm:$0xc] }
 0x85e   :  { %v1695_v43 = vmax.f32 %v1680_v9, 0.0 }
 0x860   :  { %v1662_v38 = vpop.f32.mrf.mxu0  ;;  %1809 = vmatmul.f32.gmra.mxu1 %v1695_v43 }
 0x861   :  { %v1663_v40 = vadd.f32 %v1662_v38, %v3194_v45  ;;  %v1966_v38 = vor.u32 %v1970_v11, %v1965_v21 }
 0x863   :  { %v1698_v34 = vmax.f32 %v1663_v40, 0.0  ;;  %v1681_v15 = vpop.f32.mrf.mxu1 }
 0x864   :  { %v1682_v1 = vadd.f32 %v1681_v15, %v3194_v45 }
 0x865   :  { %1783 = vmatmul.f32.gmra.mxu0 %v1698_v34  ;;  %v1832_v34 = vrot.slane %v1966_v38, 2 }
 0x866   :  { %v1699_v48 = vmax.f32 %v1682_v1, 0.0 }
 0x868   :  { %1812 = vmatmul.f32.gmra.mxu1 %v1699_v48 }
 0x871   :  { %v1617_v3 = vpop.f32.mrf.mxu2 }
 0x872   :  { %v1618_v50 = vadd.f32 %v1617_v3, %v3191_v4  ;;  %v1825_v3 = vpop.permute.xlu2 %1824 }
 0x874   :  { %v1684_v27 = vmax.f32 %v1618_v50, 0.0 }
 0x876   :  { %1716 = vmatmul.f32.vlgmr.msra.gmra.mxu2 %v1684_v27 }
 0x879   :  { %v1619_v42 = vpop.f32.mrf.mxu2 }
 0x87a   :  { %v1620_v31 = vadd.f32 %v1619_v42, %v3192_v41 }
 0x87c   :  { %v1688_v61 = vmax.f32 %v1620_v31, 0.0 }
 0x87d   :  { %v1636_v25 = vpop.f32.mrf.mxu3 }
 0x87e   :  { %v1637_v35 = vadd.f32 %v1636_v25, %v3191_v4  ;;  %1719 = vmatmul.f32.gmra.mxu2 %v1688_v61 }
 0x880   :  { %v1685_v51 = vmax.f32 %v1637_v35, 0.0 }
 0x881   :  { %v1622_v0 = vpop.f32.mrf.mxu2 }
 0x882   :  { %v1623_v20 = vadd.f32 %v1622_v0, %v3193_v46  ;;  %1745 = vmatmul.f32.vlgmr.msra.gmra.mxu3 %v1685_v51 }
 0x884   :  { %v1692_v49 = vmax.f32 %v1623_v20, 0.0 }
 0x885   :  { %v1638_v26 = vpop.f32.mrf.mxu3 }
 0x886   :  { %v1639_v37 = vadd.f32 %v1638_v26, %v3192_v41  ;;  %1722 = vmatmul.f32.gmra.mxu2 %v1692_v49 }
 0x888   :  { %v1689_v62 = vmax.f32 %v1639_v37, 0.0 }
 0x889   :  { %v1624_v58 = vpop.f32.mrf.mxu2 }
 0x88a   :  { %v1625_v13 = vadd.f32 %v1624_v58, %v3194_v45  ;;  %1748 = vmatmul.f32.gmra.mxu3 %v1689_v62  ;;  %v1820_v15 = vpop.permute.xlu1 %1819 }
 0x88c   :  { %v1696_v55 = vmax.f32 %v1625_v13, 0.0 }
 0x88d   :  { %v1641_v52 = vpop.f32.mrf.mxu3 }
 0x88e   :  { %v1642_v16 = vadd.f32 %v1641_v52, %v3193_v46  ;;  %1725 = vmatmul.f32.gmra.mxu2 %v1696_v55 }
 0x890   :  { %v1693_v24 = vmax.f32 %v1642_v16, 0.0 }
 0x892   :  { %1751 = vmatmul.f32.gmra.mxu3 %v1693_v24 }
 0x895   :  { %v1643_v33 = vpop.f32.mrf.mxu3 }
 0x896   :  { %v1644_v18 = vadd.f32 %v1643_v33, %v3194_v45 }
 0x898   :  { %v1697_v14 = vmax.f32 %v1644_v18, 0.0 }
 0x89a   :  { %1754 = vmatmul.f32.gmra.mxu3 %v1697_v14 }
 0x8ca   :  { %v1775_v7 = vpop.f32.mrf.mxu0 }
 0x8cd   :  { %v1804_v10 = vpop.f32.mrf.mxu1 }
 0x8d2   :  { %v1778_v2 = vpop.f32.mrf.mxu0 }
 0x8d5   :  { %v1807_v39 = vpop.f32.mrf.mxu1 }
 0x8da   :  { %v1781_v28 = vpop.f32.mrf.mxu0 }
 0x8dd   :  { %v1810_v19 = vpop.f32.mrf.mxu1 }
 0x8e2   :  { %v1784_v36 = vpop.f32.mrf.mxu0 }
 0x8e5   :  { %v1813_v29 = vpop.f32.mrf.mxu1 }
 0x8f9   :  { %v1717_v47 = vpop.f32.mrf.mxu2 }
 0x901   :  { %v1720_v60 = vpop.f32.mrf.mxu2 }
 0x905   :  { %v1746_v59 = vpop.f32.mrf.mxu3 }
 0x906   :  { %v1747_v8 = vadd.f32 %v1746_v59, %v1717_v47 }
 0x908   :  { %v1776_v22 = vadd.f32 %v1775_v7, %v1747_v8 }
 0x909   :  { %v1723_v57 = vpop.f32.mrf.mxu2 }
 0x90a   :  { %v1805_v45 = vadd.f32 %v1804_v10, %v1776_v22 }
 0x90d   :  { %v1749_v23 = vpop.f32.mrf.mxu3 }
 0x90e   :  { %v1750_v5 = vadd.f32 %v1749_v23, %v1720_v60 }
 0x910   :  { %v1779_v54 = vadd.f32 %v1778_v2, %v1750_v5 }
 0x911   :  { %v1726_v44 = vpop.f32.mrf.mxu2 }
 0x912   :  { %v1808_v9 = vadd.f32 %v1807_v39, %v1779_v54 }
 0x914   :  { %v1816_v40 = vpack.c.bf16 %v1808_v9, %v1805_v45 }
 0x915   :  { %v1752_v4 = vpop.f32.mrf.mxu3 }
 0x916   :  { %v1753_v56 = vadd.f32 %v1752_v4, %v1723_v57 }
 0x918   :  { %v1782_v41 = vadd.f32 %v1781_v28, %v1753_v56 }
 0x91a   :  { %v1811_v46 = vadd.f32 %v1810_v19, %v1782_v41 }
 0x91d   :  { %v1755_v6 = vpop.f32.mrf.mxu3 }
 0x91e   :  { %v1756_v17 = vadd.f32 %v1755_v6, %v1726_v44 }
 0x920   :  { %v1785_v12 = vadd.f32 %v1784_v36, %v1756_v17 }
 0x922   :  { %v1814_v30 = vadd.f32 %v1813_v29, %v1785_v12 }
 0x924   :  { %v1817_v43 = vpack.c.bf16 %v1814_v30, %v1811_v46 }
 0x926   :  { %1842 = vmatpush.bf16.msrb.mxu2 %v1817_v43 }
 0x92a   :  { %1843 = vmatpush.bf16.msrb.mxu2 %v1816_v40 }
 0x92d   :  { %1967 = vmatmul.msk.bf16.vlgmr.msrb.gmra.mxu2 %vm369_vm2, %v1832_v34 }
 0x9b0   :  { %v1845_v1 = vpop.f32.mrf.mxu2 }
 0x9b1   :  { %v1846_v48 = vadd.f32 %v1845_v1, %v1820_v15 }
 0x9b3   :  { %1850 = vst.msk [vmem:[%s3166_s4] sm:$0xff] %vm403_vm3, %v1846_v48 }
 0x9b8   :  { %v1847_v50 = vpop.f32.mrf.mxu2 }
 0x9b9   :  { %v1848_v27 = vadd.f32 %v1847_v50, %v1825_v3 }
 0x9bb   :  { %1852 = vst.msk [vmem:[%s3166_s4 + $0x8] sm:$0x3] %vm1851_vm4, %v1848_v27 }

</bundles_post_ra>
